<compile_context>
chip_gen: v6e
topology: v6e:2x2x1
jax: 0.10.0
libtpu: 0.0.40
codegen_flags: <defaults>
</compile_context>

<pallas_src>
import math

import jax
import jax.numpy as jnp
from jax.experimental import pallas as pl
from jax.experimental.pallas import tpu as pltpu  # noqa: F401  (TPU backend)

# --- tiny BERT config (small shapes consistent with the module's forward) ---
BATCH = 2
SEQ = 8          # max_length
HIDDEN = 32
HEADS = 2
HEAD_DIM = HIDDEN // HEADS
INTER = 64
LAYERS = 2
VOCAB = 64
LN_EPS = 1e-12


# ----------------------------- in-kernel helpers -----------------------------
def _layernorm(x, g, b):
    mu = jnp.mean(x, axis=-1, keepdims=True)
    var = jnp.mean(jnp.square(x - mu), axis=-1, keepdims=True)
    return (x - mu) * jax.lax.rsqrt(var + LN_EPS) * g + b


def _gelu(x):
    # tanh approximation (HF BERT default is exact erf GELU; close enough here)
    c = math.sqrt(2.0 / math.pi)
    return 0.5 * x * (1.0 + jnp.tanh(c * (x + 0.044715 * x * x * x)))


def _softmax(x):
    m = jnp.max(x, axis=-1, keepdims=True)
    e = jnp.exp(x - m)
    return e * pl.reciprocal(jnp.sum(e, axis=-1, keepdims=True), approx=True)


# ------------------------------- fused kernel --------------------------------
def bert_fused_kernel(emb_ref, bias_ref,
                      emb_g_ref, emb_b_ref,
                      wqkv_ref, bqkv_ref, wo_ref, bo_ref,
                      ln1g_ref, ln1b_ref, wi_ref, bi_ref,
                      wf_ref, bf_ref, ln2g_ref, ln2b_ref,
                      poolw_ref, poolb_ref,
                      seq_ref, pooled_ref):
    # emb: (B*S, H) f32   bias: (B*S, B*S) f32 block-diagonal additive mask
    x = _layernorm(emb_ref[...], emb_g_ref[...], emb_b_ref[...])     # (B*S, H)
    abias = bias_ref[...]
    scale = 1.0 / math.sqrt(HEAD_DIM)

    for l in range(LAYERS):                     # layers unrolled, x stays on-chip
        wqkv = wqkv_ref[l]                      # (H, 3H) bf16
        wo = wo_ref[l]                          # (H, H)  bf16

        # Fused QKV projection: one (B*S, H) @ (H, 3H) MXU push.
        qkv = jnp.dot(x.astype(jnp.bfloat16), wqkv,
                      preferred_element_type=jnp.float32) + bqkv_ref[l]
        q = qkv[:, 0 * HIDDEN:1 * HIDDEN]
        k = qkv[:, 1 * HIDDEN:2 * HIDDEN]
        v = qkv[:, 2 * HIDDEN:3 * HIDDEN]

        # Multi-head attention over the flattened token axis; the block-diagonal
        # bias keeps batches independent.  Output projection folded per head:
        #   concat_h(P_h V_h) @ Wo == sum_h (P_h V_h) @ Wo[h*hd:(h+1)*hd, :]
        attn = jnp.zeros((BATCH * SEQ, HIDDEN), jnp.float32)
        for h in range(HEADS):
            lo, hi = h * HEAD_DIM, (h + 1) * HEAD_DIM
            qh = q[:, lo:hi].astype(jnp.bfloat16)
            kh = k[:, lo:hi].astype(jnp.bfloat16)
            vh = v[:, lo:hi].astype(jnp.bfloat16)
            scores = jax.lax.dot_general(
                qh, kh, (((1,), (1,)), ((), ())),
                preferred_element_type=jnp.float32) * scale + abias   # (BS, BS)
            probs = _softmax(scores)
            head_out = jnp.dot(probs.astype(jnp.bfloat16), vh,
                               preferred_element_type=jnp.float32)    # (BS, hd)
            attn = attn + jnp.dot(head_out.astype(jnp.bfloat16), wo[lo:hi, :],
                                  preferred_element_type=jnp.float32)

        h1 = _layernorm(x + attn + bo_ref[l], ln1g_ref[l], ln1b_ref[l])

        inter = _gelu(jnp.dot(h1.astype(jnp.bfloat16), wi_ref[l],
                              preferred_element_type=jnp.float32) + bi_ref[l])
        ffn = jnp.dot(inter.astype(jnp.bfloat16), wf_ref[l],
                      preferred_element_type=jnp.float32) + bf_ref[l]
        x = _layernorm(h1 + ffn, ln2g_ref[l], ln2b_ref[l])

    seq_ref[...] = x.astype(seq_ref.dtype)

    # tanh pooler: run on all rows (same single MXU tile), keep the [CLS] rows.
    pooled_all = jnp.tanh(
        jnp.dot(x.astype(jnp.bfloat16), poolw_ref[...],
                preferred_element_type=jnp.float32) + poolb_ref[...])
    for b in range(BATCH):
        pooled_ref[b:b + 1, :] = pooled_all[b * SEQ:b * SEQ + 1, :].astype(
            pooled_ref.dtype)


# ------------------------------ pallas_call glue ------------------------------
def bert_fused_call(emb_flat, attn_bias, p):
    inputs = (emb_flat, attn_bias, p["emb_ln_g"], p["emb_ln_b"],
              p["wqkv"], p["bqkv"], p["wo"], p["bo"],
              p["ln1_g"], p["ln1_b"], p["wi"], p["bi"],
              p["wf"], p["bf"], p["ln2_g"], p["ln2_b"],
              p["pool_w"], p["pool_b"])
    out_shape = (jax.ShapeDtypeStruct((BATCH * SEQ, HIDDEN), jnp.float32),
                 jax.ShapeDtypeStruct((BATCH, HIDDEN), jnp.float32))

    tokens = BATCH * SEQ
    per_layer_flops = (2 * tokens * HIDDEN * 3 * HIDDEN              # fused QKV
                       + HEADS * 2 * 2 * tokens * tokens * HEAD_DIM  # scores + PV
                       + HEADS * 2 * tokens * HEAD_DIM * HIDDEN      # Wo fold
                       + 2 * tokens * HIDDEN * INTER * 2)            # FFN
    flops = LAYERS * per_layer_flops + 2 * tokens * HIDDEN * HIDDEN  # + pooler
    transcendentals = (LAYERS * (HEADS * tokens * tokens             # softmax exp
                                 + tokens * INTER)                   # GELU tanh
                       + tokens * HIDDEN                             # pooler tanh
                       + (2 * LAYERS + 1) * tokens)                  # LN rsqrt
    bytes_accessed = (sum(int(a.size) * a.dtype.itemsize for a in inputs)
                      + (BATCH * SEQ * HIDDEN + BATCH * HIDDEN) * 4)

    seq_flat, pooled = pl.pallas_call(
        bert_fused_kernel,
        out_shape=out_shape,
        cost_estimate=pl.CostEstimate(flops=flops,
                                      transcendentals=transcendentals,
                                      bytes_accessed=bytes_accessed),
    )(*inputs)
    return seq_flat.reshape(BATCH, SEQ, HIDDEN), pooled


# --------------------------------- the model ---------------------------------
def init_params(key):
    keys = iter(jax.random.split(key, 32))

    def w(shape, dtype=jnp.bfloat16):
        return (0.02 * jax.random.normal(next(keys), shape,
                                         jnp.float32)).astype(dtype)

    ones = lambda s: jnp.ones(s, jnp.float32)
    zeros = lambda s: jnp.zeros(s, jnp.float32)

    return {
        # embeddings stay f32 (gathered in JAX glue, summed, LayerNorm in-kernel)
        "word_emb": w((VOCAB, HIDDEN), jnp.float32),
        "pos_emb": w((SEQ, HIDDEN), jnp.float32),
        "type_emb": w((2, HIDDEN), jnp.float32),
        "emb_ln_g": ones((1, HIDDEN)), "emb_ln_b": zeros((1, HIDDEN)),
        # per-layer weights stacked on a leading LAYERS axis; MXU operands bf16
        "wqkv": w((LAYERS, HIDDEN, 3 * HIDDEN)),
        "bqkv": zeros((LAYERS, 1, 3 * HIDDEN)),
        "wo": w((LAYERS, HIDDEN, HIDDEN)), "bo": zeros((LAYERS, 1, HIDDEN)),
        "ln1_g": ones((LAYERS, 1, HIDDEN)), "ln1_b": zeros((LAYERS, 1, HIDDEN)),
        "wi": w((LAYERS, HIDDEN, INTER)), "bi": zeros((LAYERS, 1, INTER)),
        "wf": w((LAYERS, INTER, HIDDEN)), "bf": zeros((LAYERS, 1, HIDDEN)),
        "ln2_g": ones((LAYERS, 1, HIDDEN)), "ln2_b": zeros((LAYERS, 1, HIDDEN)),
        "pool_w": w((HIDDEN, HIDDEN)), "pool_b": zeros((1, HIDDEN)),
    }


def _attention_bias(mask):
    """Block-diagonal additive bias over the flattened (B*S) token axis."""
    B, S = mask.shape
    pad = (1.0 - mask.astype(jnp.float32)) * -10000.0       # BERT mask convention
    pad_flat = pad.reshape(B * S)
    row_batch = jnp.repeat(jnp.arange(B), S)
    same_batch = row_batch[:, None] == row_batch[None, :]    # (BS, BS)
    return jnp.where(same_batch, pad_flat[None, :], -1e9).astype(jnp.float32)


def bert_forward(params, word_ids, attention_mask):
    """Returns (sequence_output [B,S,H], pooled_output [B,H]) like BertModel."""
    # Embedding gathers are JAX glue; everything after runs in the fused kernel.
    emb = jnp.take(params["word_emb"], word_ids, axis=0)              # (B, S, H)
    emb = emb + params["pos_emb"][None, :, :]
    emb = emb + params["type_emb"][0][None, None, :]                  # token_type=0
    emb_flat = emb.reshape(BATCH * SEQ, HIDDEN)
    attn_bias = _attention_bias(attention_mask)                       # (BS, BS)
    return bert_fused_call(emb_flat, attn_bias, params)


def bert_sentence_encoder(params, inputs, cat_entity_rep=False):
    seq_out, pooled = bert_forward(params, inputs["word"], inputs["mask"])
    if not cat_entity_rep:
        return pooled                                                 # (B, H)
    batch_range = jnp.arange(inputs["word"].shape[0])
    h_state = seq_out[batch_range, inputs["pos1"]]                    # (B, H)
    t_state = seq_out[batch_range, inputs["pos2"]]                    # (B, H)
    return jnp.concatenate([h_state, t_state], axis=-1)               # (B, 2H)


# ------------------------------------ main ------------------------------------
if __name__ == "__main__":
    root = jax.random.PRNGKey(0)
    k_params, k_word = jax.random.split(root)

    params = init_params(k_params)

    word = jax.random.randint(k_word, (BATCH, SEQ), 0, VOCAB, dtype=jnp.int32)
    mask = jnp.ones((BATCH, SEQ), jnp.int32).at[:, SEQ - 2:].set(0)  # some padding
    pos1 = jnp.array([1, 2], dtype=jnp.int32)
    pos2 = jnp.array([3, 5], dtype=jnp.int32)
    inputs = {"word": word, "mask": mask, "pos1": pos1, "pos2": pos2}

    out_pooled = bert_sentence_encoder(params, inputs, cat_entity_rep=False)
    out_entity = bert_sentence_encoder(params, inputs, cat_entity_rep=True)
    jax.block_until_ready((out_pooled, out_entity))

    assert out_pooled.shape == (BATCH, HIDDEN)
    assert out_entity.shape == (BATCH, 2 * HIDDEN)
    assert bool(jnp.all(jnp.isfinite(out_pooled)))
    assert bool(jnp.all(jnp.isfinite(out_entity)))
    print("KERNEL_OK")
</pallas_src>

<mosaic_0001>
module attributes {stable_mosaic.version = 11 : i64} {
  func.func @bert_fused_kernel(%arg0: memref<16x32xf32, #tpu.memory_space<vmem>>, %arg1: memref<16x16xf32, #tpu.memory_space<vmem>>, %arg2: memref<1x32xf32, #tpu.memory_space<vmem>>, %arg3: memref<1x32xf32, #tpu.memory_space<vmem>>, %arg4: memref<2x32x96xbf16, #tpu.memory_space<vmem>>, %arg5: memref<2x1x96xf32, #tpu.memory_space<vmem>>, %arg6: memref<2x32x32xbf16, #tpu.memory_space<vmem>>, %arg7: memref<2x1x32xf32, #tpu.memory_space<vmem>>, %arg8: memref<2x1x32xf32, #tpu.memory_space<vmem>>, %arg9: memref<2x1x32xf32, #tpu.memory_space<vmem>>, %arg10: memref<2x32x64xbf16, #tpu.memory_space<vmem>>, %arg11: memref<2x1x64xf32, #tpu.memory_space<vmem>>, %arg12: memref<2x64x32xbf16, #tpu.memory_space<vmem>>, %arg13: memref<2x1x32xf32, #tpu.memory_space<vmem>>, %arg14: memref<2x1x32xf32, #tpu.memory_space<vmem>>, %arg15: memref<2x1x32xf32, #tpu.memory_space<vmem>>, %arg16: memref<32x32xbf16, #tpu.memory_space<vmem>>, %arg17: memref<1x32xf32, #tpu.memory_space<vmem>>, %arg18: memref<16x32xf32, #tpu.memory_space<vmem>>, %arg19: memref<2x32xf32, #tpu.memory_space<vmem>>) attributes {dimension_semantics = [], scalar_prefetch = 0 : i64, scratch_operands = 0 : i64, tpu.core_type = #tpu.core_type<tc>} {
    %c0 = arith.constant 0 : index
    %c0_0 = arith.constant 0 : index
    %0 = vector.load %arg0[%c0, %c0_0] : memref<16x32xf32, #tpu.memory_space<vmem>>, vector<16x32xf32>
    %c0_1 = arith.constant 0 : index
    %c0_2 = arith.constant 0 : index
    %1 = vector.load %arg2[%c0_1, %c0_2] : memref<1x32xf32, #tpu.memory_space<vmem>>, vector<1x32xf32>
    %c0_3 = arith.constant 0 : index
    %c0_4 = arith.constant 0 : index
    %2 = vector.load %arg3[%c0_3, %c0_4] : memref<1x32xf32, #tpu.memory_space<vmem>>, vector<1x32xf32>
    %cst = arith.constant dense<0.000000e+00> : vector<16xf32>
    %3 = vector.multi_reduction <add>, %0, %cst [1] : vector<16x32xf32> to vector<16xf32>
    %4 = vector.shape_cast %3 : vector<16xf32> to vector<16x1xf32>
    %cst_5 = arith.constant 3.200000e+01 : f32
    %5 = vector.broadcast %cst_5 : f32 to vector<16x1xf32>
    %6 = arith.divf %4, %5 : vector<16x1xf32>
    %7 = vector.broadcast %6 : vector<16x1xf32> to vector<16x32xf32>
    %8 = arith.subf %0, %7 : vector<16x32xf32>
    %9 = arith.mulf %8, %8 : vector<16x32xf32>
    %cst_6 = arith.constant dense<0.000000e+00> : vector<16xf32>
    %10 = vector.multi_reduction <add>, %9, %cst_6 [1] : vector<16x32xf32> to vector<16xf32>
    %11 = vector.shape_cast %10 : vector<16xf32> to vector<16x1xf32>
    %cst_7 = arith.constant 3.200000e+01 : f32
    %12 = vector.broadcast %cst_7 : f32 to vector<16x1xf32>
    %13 = arith.divf %11, %12 : vector<16x1xf32>
    %14 = vector.broadcast %6 : vector<16x1xf32> to vector<16x32xf32>
    %15 = arith.subf %0, %14 : vector<16x32xf32>
    %cst_8 = arith.constant 9.99999996E-13 : f32
    %16 = vector.broadcast %cst_8 : f32 to vector<16x1xf32>
    %17 = arith.addf %13, %16 : vector<16x1xf32>
    %18 = math.rsqrt %17 : vector<16x1xf32>
    %19 = vector.broadcast %18 : vector<16x1xf32> to vector<16x32xf32>
    %20 = arith.mulf %15, %19 : vector<16x32xf32>
    %21 = vector.broadcast %1 : vector<1x32xf32> to vector<16x32xf32>
    %22 = arith.mulf %20, %21 : vector<16x32xf32>
    %23 = vector.broadcast %2 : vector<1x32xf32> to vector<16x32xf32>
    %24 = arith.addf %22, %23 : vector<16x32xf32>
    %c0_9 = arith.constant 0 : index
    %c0_10 = arith.constant 0 : index
    %25 = vector.load %arg1[%c0_9, %c0_10] : memref<16x16xf32, #tpu.memory_space<vmem>>, vector<16x16xf32>
    %c0_11 = arith.constant 0 : index
    %c0_12 = arith.constant 0 : index
    %c0_13 = arith.constant 0 : index
    %26 = vector.load %arg4[%c0_11, %c0_12, %c0_13] : memref<2x32x96xbf16, #tpu.memory_space<vmem>>, vector<1x32x96xbf16>
    %27 = vector.shape_cast %26 : vector<1x32x96xbf16> to vector<32x96xbf16>
    %c0_14 = arith.constant 0 : index
    %c0_15 = arith.constant 0 : index
    %c0_16 = arith.constant 0 : index
    %28 = vector.load %arg6[%c0_14, %c0_15, %c0_16] : memref<2x32x32xbf16, #tpu.memory_space<vmem>>, vector<1x32x32xbf16>
    %29 = vector.shape_cast %28 : vector<1x32x32xbf16> to vector<32x32xbf16>
    %30 = arith.truncf %24 : vector<16x32xf32> to vector<16x32xbf16>
    %cst_17 = arith.constant dense<0.000000e+00> : vector<16x96xf32>
    %31 = tpu.matmul %30, %27, %cst_17 {dimension_numbers = #tpu.dot_dimension_numbers<[1], [0], [0], [1], [0, 0, 1, 1], [], []>} : vector<16x32xbf16>, vector<32x96xbf16>, vector<16x96xf32> -> vector<16x96xf32>
    %c0_18 = arith.constant 0 : index
    %c0_19 = arith.constant 0 : index
    %c0_20 = arith.constant 0 : index
    %32 = vector.load %arg5[%c0_18, %c0_19, %c0_20] : memref<2x1x96xf32, #tpu.memory_space<vmem>>, vector<1x1x96xf32>
    %33 = vector.shape_cast %32 : vector<1x1x96xf32> to vector<1x96xf32>
    %34 = vector.broadcast %33 : vector<1x96xf32> to vector<16x96xf32>
    %35 = arith.addf %31, %34 : vector<16x96xf32>
    %36 = vector.extract_strided_slice %35 {offsets = [0, 0], sizes = [16, 32], strides = [1, 1]} : vector<16x96xf32> to vector<16x32xf32>
    %37 = vector.extract_strided_slice %35 {offsets = [0, 32], sizes = [16, 32], strides = [1, 1]} : vector<16x96xf32> to vector<16x32xf32>
    %38 = vector.extract_strided_slice %35 {offsets = [0, 64], sizes = [16, 32], strides = [1, 1]} : vector<16x96xf32> to vector<16x32xf32>
    %cst_21 = arith.constant 0.000000e+00 : f32
    %39 = vector.broadcast %cst_21 : f32 to vector<16x32xf32>
    %40 = vector.extract_strided_slice %36 {offsets = [0, 0], sizes = [16, 16], strides = [1, 1]} : vector<16x32xf32> to vector<16x16xf32>
    %41 = arith.truncf %40 : vector<16x16xf32> to vector<16x16xbf16>
    %42 = vector.extract_strided_slice %37 {offsets = [0, 0], sizes = [16, 16], strides = [1, 1]} : vector<16x32xf32> to vector<16x16xf32>
    %43 = arith.truncf %42 : vector<16x16xf32> to vector<16x16xbf16>
    %44 = vector.extract_strided_slice %38 {offsets = [0, 0], sizes = [16, 16], strides = [1, 1]} : vector<16x32xf32> to vector<16x16xf32>
    %45 = arith.truncf %44 : vector<16x16xf32> to vector<16x16xbf16>
    %cst_22 = arith.constant dense<0.000000e+00> : vector<16x16xf32>
    %46 = tpu.matmul %41, %43, %cst_22 {dimension_numbers = #tpu.dot_dimension_numbers<[1], [1], [0], [0], [0, 0, 1, 0], [], []>} : vector<16x16xbf16>, vector<16x16xbf16>, vector<16x16xf32> -> vector<16x16xf32>
    %cst_23 = arith.constant 2.500000e-01 : f32
    %47 = vector.broadcast %cst_23 : f32 to vector<16x16xf32>
    %48 = arith.mulf %46, %47 : vector<16x16xf32>
    %49 = arith.addf %48, %25 : vector<16x16xf32>
    %cst_24 = arith.constant dense<0xFF800000> : vector<16xf32>
    %50 = vector.multi_reduction <maximumf>, %49, %cst_24 [1] : vector<16x16xf32> to vector<16xf32>
    %51 = vector.shape_cast %50 : vector<16xf32> to vector<16x1xf32>
    %52 = vector.broadcast %51 : vector<16x1xf32> to vector<16x16xf32>
    %53 = arith.subf %49, %52 : vector<16x16xf32>
    %54 = math.exp %53 : vector<16x16xf32>
    %cst_25 = arith.constant dense<0.000000e+00> : vector<16xf32>
    %55 = vector.multi_reduction <add>, %54, %cst_25 [1] : vector<16x16xf32> to vector<16xf32>
    %56 = vector.shape_cast %55 : vector<16xf32> to vector<16x1xf32>
    %57 = tpu.reciprocal %56 {approx = true} : vector<16x1xf32> -> vector<16x1xf32>
    %58 = vector.broadcast %57 : vector<16x1xf32> to vector<16x16xf32>
    %59 = arith.mulf %54, %58 : vector<16x16xf32>
    %60 = arith.truncf %59 : vector<16x16xf32> to vector<16x16xbf16>
    %cst_26 = arith.constant dense<0.000000e+00> : vector<16x16xf32>
    %61 = tpu.matmul %60, %45, %cst_26 {dimension_numbers = #tpu.dot_dimension_numbers<[1], [0], [0], [1], [0, 0, 1, 1], [], []>} : vector<16x16xbf16>, vector<16x16xbf16>, vector<16x16xf32> -> vector<16x16xf32>
    %62 = arith.truncf %61 : vector<16x16xf32> to vector<16x16xbf16>
    %63 = vector.extract_strided_slice %29 {offsets = [0, 0], sizes = [16, 32], strides = [1, 1]} : vector<32x32xbf16> to vector<16x32xbf16>
    %cst_27 = arith.constant dense<0.000000e+00> : vector<16x32xf32>
    %64 = tpu.matmul %62, %63, %cst_27 {dimension_numbers = #tpu.dot_dimension_numbers<[1], [0], [0], [1], [0, 0, 1, 1], [], []>} : vector<16x16xbf16>, vector<16x32xbf16>, vector<16x32xf32> -> vector<16x32xf32>
    %65 = arith.addf %39, %64 : vector<16x32xf32>
    %66 = vector.extract_strided_slice %36 {offsets = [0, 16], sizes = [16, 16], strides = [1, 1]} : vector<16x32xf32> to vector<16x16xf32>
    %67 = arith.truncf %66 : vector<16x16xf32> to vector<16x16xbf16>
    %68 = vector.extract_strided_slice %37 {offsets = [0, 16], sizes = [16, 16], strides = [1, 1]} : vector<16x32xf32> to vector<16x16xf32>
    %69 = arith.truncf %68 : vector<16x16xf32> to vector<16x16xbf16>
    %70 = vector.extract_strided_slice %38 {offsets = [0, 16], sizes = [16, 16], strides = [1, 1]} : vector<16x32xf32> to vector<16x16xf32>
    %71 = arith.truncf %70 : vector<16x16xf32> to vector<16x16xbf16>
    %cst_28 = arith.constant dense<0.000000e+00> : vector<16x16xf32>
    %72 = tpu.matmul %67, %69, %cst_28 {dimension_numbers = #tpu.dot_dimension_numbers<[1], [1], [0], [0], [0, 0, 1, 0], [], []>} : vector<16x16xbf16>, vector<16x16xbf16>, vector<16x16xf32> -> vector<16x16xf32>
    %cst_29 = arith.constant 2.500000e-01 : f32
    %73 = vector.broadcast %cst_29 : f32 to vector<16x16xf32>
    %74 = arith.mulf %72, %73 : vector<16x16xf32>
    %75 = arith.addf %74, %25 : vector<16x16xf32>
    %cst_30 = arith.constant dense<0xFF800000> : vector<16xf32>
    %76 = vector.multi_reduction <maximumf>, %75, %cst_30 [1] : vector<16x16xf32> to vector<16xf32>
    %77 = vector.shape_cast %76 : vector<16xf32> to vector<16x1xf32>
    %78 = vector.broadcast %77 : vector<16x1xf32> to vector<16x16xf32>
    %79 = arith.subf %75, %78 : vector<16x16xf32>
    %80 = math.exp %79 : vector<16x16xf32>
    %cst_31 = arith.constant dense<0.000000e+00> : vector<16xf32>
    %81 = vector.multi_reduction <add>, %80, %cst_31 [1] : vector<16x16xf32> to vector<16xf32>
    %82 = vector.shape_cast %81 : vector<16xf32> to vector<16x1xf32>
    %83 = tpu.reciprocal %82 {approx = true} : vector<16x1xf32> -> vector<16x1xf32>
    %84 = vector.broadcast %83 : vector<16x1xf32> to vector<16x16xf32>
    %85 = arith.mulf %80, %84 : vector<16x16xf32>
    %86 = arith.truncf %85 : vector<16x16xf32> to vector<16x16xbf16>
    %cst_32 = arith.constant dense<0.000000e+00> : vector<16x16xf32>
    %87 = tpu.matmul %86, %71, %cst_32 {dimension_numbers = #tpu.dot_dimension_numbers<[1], [0], [0], [1], [0, 0, 1, 1], [], []>} : vector<16x16xbf16>, vector<16x16xbf16>, vector<16x16xf32> -> vector<16x16xf32>
    %88 = arith.truncf %87 : vector<16x16xf32> to vector<16x16xbf16>
    %89 = vector.extract_strided_slice %29 {offsets = [16, 0], sizes = [16, 32], strides = [1, 1]} : vector<32x32xbf16> to vector<16x32xbf16>
    %cst_33 = arith.constant dense<0.000000e+00> : vector<16x32xf32>
    %90 = tpu.matmul %88, %89, %cst_33 {dimension_numbers = #tpu.dot_dimension_numbers<[1], [0], [0], [1], [0, 0, 1, 1], [], []>} : vector<16x16xbf16>, vector<16x32xbf16>, vector<16x32xf32> -> vector<16x32xf32>
    %91 = arith.addf %65, %90 : vector<16x32xf32>
    %92 = arith.addf %24, %91 : vector<16x32xf32>
    %c0_34 = arith.constant 0 : index
    %c0_35 = arith.constant 0 : index
    %c0_36 = arith.constant 0 : index
    %93 = vector.load %arg7[%c0_34, %c0_35, %c0_36] : memref<2x1x32xf32, #tpu.memory_space<vmem>>, vector<1x1x32xf32>
    %94 = vector.shape_cast %93 : vector<1x1x32xf32> to vector<1x32xf32>
    %95 = vector.broadcast %94 : vector<1x32xf32> to vector<16x32xf32>
    %96 = arith.addf %92, %95 : vector<16x32xf32>
    %c0_37 = arith.constant 0 : index
    %c0_38 = arith.constant 0 : index
    %c0_39 = arith.constant 0 : index
    %97 = vector.load %arg8[%c0_37, %c0_38, %c0_39] : memref<2x1x32xf32, #tpu.memory_space<vmem>>, vector<1x1x32xf32>
    %98 = vector.shape_cast %97 : vector<1x1x32xf32> to vector<1x32xf32>
    %c0_40 = arith.constant 0 : index
    %c0_41 = arith.constant 0 : index
    %c0_42 = arith.constant 0 : index
    %99 = vector.load %arg9[%c0_40, %c0_41, %c0_42] : memref<2x1x32xf32, #tpu.memory_space<vmem>>, vector<1x1x32xf32>
    %100 = vector.shape_cast %99 : vector<1x1x32xf32> to vector<1x32xf32>
    %cst_43 = arith.constant dense<0.000000e+00> : vector<16xf32>
    %101 = vector.multi_reduction <add>, %96, %cst_43 [1] : vector<16x32xf32> to vector<16xf32>
    %102 = vector.shape_cast %101 : vector<16xf32> to vector<16x1xf32>
    %cst_44 = arith.constant 3.200000e+01 : f32
    %103 = vector.broadcast %cst_44 : f32 to vector<16x1xf32>
    %104 = arith.divf %102, %103 : vector<16x1xf32>
    %105 = vector.broadcast %104 : vector<16x1xf32> to vector<16x32xf32>
    %106 = arith.subf %96, %105 : vector<16x32xf32>
    %107 = arith.mulf %106, %106 : vector<16x32xf32>
    %cst_45 = arith.constant dense<0.000000e+00> : vector<16xf32>
    %108 = vector.multi_reduction <add>, %107, %cst_45 [1] : vector<16x32xf32> to vector<16xf32>
    %109 = vector.shape_cast %108 : vector<16xf32> to vector<16x1xf32>
    %cst_46 = arith.constant 3.200000e+01 : f32
    %110 = vector.broadcast %cst_46 : f32 to vector<16x1xf32>
    %111 = arith.divf %109, %110 : vector<16x1xf32>
    %112 = vector.broadcast %104 : vector<16x1xf32> to vector<16x32xf32>
    %113 = arith.subf %96, %112 : vector<16x32xf32>
    %cst_47 = arith.constant 9.99999996E-13 : f32
    %114 = vector.broadcast %cst_47 : f32 to vector<16x1xf32>
    %115 = arith.addf %111, %114 : vector<16x1xf32>
    %116 = math.rsqrt %115 : vector<16x1xf32>
    %117 = vector.broadcast %116 : vector<16x1xf32> to vector<16x32xf32>
    %118 = arith.mulf %113, %117 : vector<16x32xf32>
    %119 = vector.broadcast %98 : vector<1x32xf32> to vector<16x32xf32>
    %120 = arith.mulf %118, %119 : vector<16x32xf32>
    %121 = vector.broadcast %100 : vector<1x32xf32> to vector<16x32xf32>
    %122 = arith.addf %120, %121 : vector<16x32xf32>
    %123 = arith.truncf %122 : vector<16x32xf32> to vector<16x32xbf16>
    %c0_48 = arith.constant 0 : index
    %c0_49 = arith.constant 0 : index
    %c0_50 = arith.constant 0 : index
    %124 = vector.load %arg10[%c0_48, %c0_49, %c0_50] : memref<2x32x64xbf16, #tpu.memory_space<vmem>>, vector<1x32x64xbf16>
    %125 = vector.shape_cast %124 : vector<1x32x64xbf16> to vector<32x64xbf16>
    %cst_51 = arith.constant dense<0.000000e+00> : vector<16x64xf32>
    %126 = tpu.matmul %123, %125, %cst_51 {dimension_numbers = #tpu.dot_dimension_numbers<[1], [0], [0], [1], [0, 0, 1, 1], [], []>} : vector<16x32xbf16>, vector<32x64xbf16>, vector<16x64xf32> -> vector<16x64xf32>
    %c0_52 = arith.constant 0 : index
    %c0_53 = arith.constant 0 : index
    %c0_54 = arith.constant 0 : index
    %127 = vector.load %arg11[%c0_52, %c0_53, %c0_54] : memref<2x1x64xf32, #tpu.memory_space<vmem>>, vector<1x1x64xf32>
    %128 = vector.shape_cast %127 : vector<1x1x64xf32> to vector<1x64xf32>
    %129 = vector.broadcast %128 : vector<1x64xf32> to vector<16x64xf32>
    %130 = arith.addf %126, %129 : vector<16x64xf32>
    %cst_55 = arith.constant 5.000000e-01 : f32
    %131 = vector.broadcast %cst_55 : f32 to vector<16x64xf32>
    %132 = arith.mulf %131, %130 : vector<16x64xf32>
    %cst_56 = arith.constant 4.471500e-02 : f32
    %133 = vector.broadcast %cst_56 : f32 to vector<16x64xf32>
    %134 = arith.mulf %133, %130 : vector<16x64xf32>
    %135 = arith.mulf %134, %130 : vector<16x64xf32>
    %136 = arith.mulf %135, %130 : vector<16x64xf32>
    %137 = arith.addf %130, %136 : vector<16x64xf32>
    %cst_57 = arith.constant 0.797884583 : f32
    %138 = vector.broadcast %cst_57 : f32 to vector<16x64xf32>
    %139 = arith.mulf %138, %137 : vector<16x64xf32>
    %140 = math.tanh %139 : vector<16x64xf32>
    %cst_58 = arith.constant 1.000000e+00 : f32
    %141 = vector.broadcast %cst_58 : f32 to vector<16x64xf32>
    %142 = arith.addf %141, %140 : vector<16x64xf32>
    %143 = arith.mulf %132, %142 : vector<16x64xf32>
    %144 = arith.truncf %143 : vector<16x64xf32> to vector<16x64xbf16>
    %c0_59 = arith.constant 0 : index
    %c0_60 = arith.constant 0 : index
    %c0_61 = arith.constant 0 : index
    %145 = vector.load %arg12[%c0_59, %c0_60, %c0_61] : memref<2x64x32xbf16, #tpu.memory_space<vmem>>, vector<1x64x32xbf16>
    %146 = vector.shape_cast %145 : vector<1x64x32xbf16> to vector<64x32xbf16>
    %cst_62 = arith.constant dense<0.000000e+00> : vector<16x32xf32>
    %147 = tpu.matmul %144, %146, %cst_62 {dimension_numbers = #tpu.dot_dimension_numbers<[1], [0], [0], [1], [0, 0, 1, 1], [], []>} : vector<16x64xbf16>, vector<64x32xbf16>, vector<16x32xf32> -> vector<16x32xf32>
    %c0_63 = arith.constant 0 : index
    %c0_64 = arith.constant 0 : index
    %c0_65 = arith.constant 0 : index
    %148 = vector.load %arg13[%c0_63, %c0_64, %c0_65] : memref<2x1x32xf32, #tpu.memory_space<vmem>>, vector<1x1x32xf32>
    %149 = vector.shape_cast %148 : vector<1x1x32xf32> to vector<1x32xf32>
    %150 = vector.broadcast %149 : vector<1x32xf32> to vector<16x32xf32>
    %151 = arith.addf %147, %150 : vector<16x32xf32>
    %152 = arith.addf %122, %151 : vector<16x32xf32>
    %c0_66 = arith.constant 0 : index
    %c0_67 = arith.constant 0 : index
    %c0_68 = arith.constant 0 : index
    %153 = vector.load %arg14[%c0_66, %c0_67, %c0_68] : memref<2x1x32xf32, #tpu.memory_space<vmem>>, vector<1x1x32xf32>
    %154 = vector.shape_cast %153 : vector<1x1x32xf32> to vector<1x32xf32>
    %c0_69 = arith.constant 0 : index
    %c0_70 = arith.constant 0 : index
    %c0_71 = arith.constant 0 : index
    %155 = vector.load %arg15[%c0_69, %c0_70, %c0_71] : memref<2x1x32xf32, #tpu.memory_space<vmem>>, vector<1x1x32xf32>
    %156 = vector.shape_cast %155 : vector<1x1x32xf32> to vector<1x32xf32>
    %cst_72 = arith.constant dense<0.000000e+00> : vector<16xf32>
    %157 = vector.multi_reduction <add>, %152, %cst_72 [1] : vector<16x32xf32> to vector<16xf32>
    %158 = vector.shape_cast %157 : vector<16xf32> to vector<16x1xf32>
    %cst_73 = arith.constant 3.200000e+01 : f32
    %159 = vector.broadcast %cst_73 : f32 to vector<16x1xf32>
    %160 = arith.divf %158, %159 : vector<16x1xf32>
    %161 = vector.broadcast %160 : vector<16x1xf32> to vector<16x32xf32>
    %162 = arith.subf %152, %161 : vector<16x32xf32>
    %163 = arith.mulf %162, %162 : vector<16x32xf32>
    %cst_74 = arith.constant dense<0.000000e+00> : vector<16xf32>
    %164 = vector.multi_reduction <add>, %163, %cst_74 [1] : vector<16x32xf32> to vector<16xf32>
    %165 = vector.shape_cast %164 : vector<16xf32> to vector<16x1xf32>
    %cst_75 = arith.constant 3.200000e+01 : f32
    %166 = vector.broadcast %cst_75 : f32 to vector<16x1xf32>
    %167 = arith.divf %165, %166 : vector<16x1xf32>
    %168 = vector.broadcast %160 : vector<16x1xf32> to vector<16x32xf32>
    %169 = arith.subf %152, %168 : vector<16x32xf32>
    %cst_76 = arith.constant 9.99999996E-13 : f32
    %170 = vector.broadcast %cst_76 : f32 to vector<16x1xf32>
    %171 = arith.addf %167, %170 : vector<16x1xf32>
    %172 = math.rsqrt %171 : vector<16x1xf32>
    %173 = vector.broadcast %172 : vector<16x1xf32> to vector<16x32xf32>
    %174 = arith.mulf %169, %173 : vector<16x32xf32>
    %175 = vector.broadcast %154 : vector<1x32xf32> to vector<16x32xf32>
    %176 = arith.mulf %174, %175 : vector<16x32xf32>
    %177 = vector.broadcast %156 : vector<1x32xf32> to vector<16x32xf32>
    %178 = arith.addf %176, %177 : vector<16x32xf32>
    %c1 = arith.constant 1 : index
    %c0_77 = arith.constant 0 : index
    %c0_78 = arith.constant 0 : index
    %179 = vector.load %arg4[%c1, %c0_77, %c0_78] : memref<2x32x96xbf16, #tpu.memory_space<vmem>>, vector<1x32x96xbf16>
    %180 = vector.shape_cast %179 : vector<1x32x96xbf16> to vector<32x96xbf16>
    %c1_79 = arith.constant 1 : index
    %c0_80 = arith.constant 0 : index
    %c0_81 = arith.constant 0 : index
    %181 = vector.load %arg6[%c1_79, %c0_80, %c0_81] : memref<2x32x32xbf16, #tpu.memory_space<vmem>>, vector<1x32x32xbf16>
    %182 = vector.shape_cast %181 : vector<1x32x32xbf16> to vector<32x32xbf16>
    %183 = arith.truncf %178 : vector<16x32xf32> to vector<16x32xbf16>
    %cst_82 = arith.constant dense<0.000000e+00> : vector<16x96xf32>
    %184 = tpu.matmul %183, %180, %cst_82 {dimension_numbers = #tpu.dot_dimension_numbers<[1], [0], [0], [1], [0, 0, 1, 1], [], []>} : vector<16x32xbf16>, vector<32x96xbf16>, vector<16x96xf32> -> vector<16x96xf32>
    %c1_83 = arith.constant 1 : index
    %c0_84 = arith.constant 0 : index
    %c0_85 = arith.constant 0 : index
    %185 = vector.load %arg5[%c1_83, %c0_84, %c0_85] : memref<2x1x96xf32, #tpu.memory_space<vmem>>, vector<1x1x96xf32>
    %186 = vector.shape_cast %185 : vector<1x1x96xf32> to vector<1x96xf32>
    %187 = vector.broadcast %186 : vector<1x96xf32> to vector<16x96xf32>
    %188 = arith.addf %184, %187 : vector<16x96xf32>
    %189 = vector.extract_strided_slice %188 {offsets = [0, 0], sizes = [16, 32], strides = [1, 1]} : vector<16x96xf32> to vector<16x32xf32>
    %190 = vector.extract_strided_slice %188 {offsets = [0, 32], sizes = [16, 32], strides = [1, 1]} : vector<16x96xf32> to vector<16x32xf32>
    %191 = vector.extract_strided_slice %188 {offsets = [0, 64], sizes = [16, 32], strides = [1, 1]} : vector<16x96xf32> to vector<16x32xf32>
    %cst_86 = arith.constant 0.000000e+00 : f32
    %192 = vector.broadcast %cst_86 : f32 to vector<16x32xf32>
    %193 = vector.extract_strided_slice %189 {offsets = [0, 0], sizes = [16, 16], strides = [1, 1]} : vector<16x32xf32> to vector<16x16xf32>
    %194 = arith.truncf %193 : vector<16x16xf32> to vector<16x16xbf16>
    %195 = vector.extract_strided_slice %190 {offsets = [0, 0], sizes = [16, 16], strides = [1, 1]} : vector<16x32xf32> to vector<16x16xf32>
    %196 = arith.truncf %195 : vector<16x16xf32> to vector<16x16xbf16>
    %197 = vector.extract_strided_slice %191 {offsets = [0, 0], sizes = [16, 16], strides = [1, 1]} : vector<16x32xf32> to vector<16x16xf32>
    %198 = arith.truncf %197 : vector<16x16xf32> to vector<16x16xbf16>
    %cst_87 = arith.constant dense<0.000000e+00> : vector<16x16xf32>
    %199 = tpu.matmul %194, %196, %cst_87 {dimension_numbers = #tpu.dot_dimension_numbers<[1], [1], [0], [0], [0, 0, 1, 0], [], []>} : vector<16x16xbf16>, vector<16x16xbf16>, vector<16x16xf32> -> vector<16x16xf32>
    %cst_88 = arith.constant 2.500000e-01 : f32
    %200 = vector.broadcast %cst_88 : f32 to vector<16x16xf32>
    %201 = arith.mulf %199, %200 : vector<16x16xf32>
    %202 = arith.addf %201, %25 : vector<16x16xf32>
    %cst_89 = arith.constant dense<0xFF800000> : vector<16xf32>
    %203 = vector.multi_reduction <maximumf>, %202, %cst_89 [1] : vector<16x16xf32> to vector<16xf32>
    %204 = vector.shape_cast %203 : vector<16xf32> to vector<16x1xf32>
    %205 = vector.broadcast %204 : vector<16x1xf32> to vector<16x16xf32>
    %206 = arith.subf %202, %205 : vector<16x16xf32>
    %207 = math.exp %206 : vector<16x16xf32>
    %cst_90 = arith.constant dense<0.000000e+00> : vector<16xf32>
    %208 = vector.multi_reduction <add>, %207, %cst_90 [1] : vector<16x16xf32> to vector<16xf32>
    %209 = vector.shape_cast %208 : vector<16xf32> to vector<16x1xf32>
    %210 = tpu.reciprocal %209 {approx = true} : vector<16x1xf32> -> vector<16x1xf32>
    %211 = vector.broadcast %210 : vector<16x1xf32> to vector<16x16xf32>
    %212 = arith.mulf %207, %211 : vector<16x16xf32>
    %213 = arith.truncf %212 : vector<16x16xf32> to vector<16x16xbf16>
    %cst_91 = arith.constant dense<0.000000e+00> : vector<16x16xf32>
    %214 = tpu.matmul %213, %198, %cst_91 {dimension_numbers = #tpu.dot_dimension_numbers<[1], [0], [0], [1], [0, 0, 1, 1], [], []>} : vector<16x16xbf16>, vector<16x16xbf16>, vector<16x16xf32> -> vector<16x16xf32>
    %215 = arith.truncf %214 : vector<16x16xf32> to vector<16x16xbf16>
    %216 = vector.extract_strided_slice %182 {offsets = [0, 0], sizes = [16, 32], strides = [1, 1]} : vector<32x32xbf16> to vector<16x32xbf16>
    %cst_92 = arith.constant dense<0.000000e+00> : vector<16x32xf32>
    %217 = tpu.matmul %215, %216, %cst_92 {dimension_numbers = #tpu.dot_dimension_numbers<[1], [0], [0], [1], [0, 0, 1, 1], [], []>} : vector<16x16xbf16>, vector<16x32xbf16>, vector<16x32xf32> -> vector<16x32xf32>
    %218 = arith.addf %192, %217 : vector<16x32xf32>
    %219 = vector.extract_strided_slice %189 {offsets = [0, 16], sizes = [16, 16], strides = [1, 1]} : vector<16x32xf32> to vector<16x16xf32>
    %220 = arith.truncf %219 : vector<16x16xf32> to vector<16x16xbf16>
    %221 = vector.extract_strided_slice %190 {offsets = [0, 16], sizes = [16, 16], strides = [1, 1]} : vector<16x32xf32> to vector<16x16xf32>
    %222 = arith.truncf %221 : vector<16x16xf32> to vector<16x16xbf16>
    %223 = vector.extract_strided_slice %191 {offsets = [0, 16], sizes = [16, 16], strides = [1, 1]} : vector<16x32xf32> to vector<16x16xf32>
    %224 = arith.truncf %223 : vector<16x16xf32> to vector<16x16xbf16>
    %cst_93 = arith.constant dense<0.000000e+00> : vector<16x16xf32>
    %225 = tpu.matmul %220, %222, %cst_93 {dimension_numbers = #tpu.dot_dimension_numbers<[1], [1], [0], [0], [0, 0, 1, 0], [], []>} : vector<16x16xbf16>, vector<16x16xbf16>, vector<16x16xf32> -> vector<16x16xf32>
    %cst_94 = arith.constant 2.500000e-01 : f32
    %226 = vector.broadcast %cst_94 : f32 to vector<16x16xf32>
    %227 = arith.mulf %225, %226 : vector<16x16xf32>
    %228 = arith.addf %227, %25 : vector<16x16xf32>
    %cst_95 = arith.constant dense<0xFF800000> : vector<16xf32>
    %229 = vector.multi_reduction <maximumf>, %228, %cst_95 [1] : vector<16x16xf32> to vector<16xf32>
    %230 = vector.shape_cast %229 : vector<16xf32> to vector<16x1xf32>
    %231 = vector.broadcast %230 : vector<16x1xf32> to vector<16x16xf32>
    %232 = arith.subf %228, %231 : vector<16x16xf32>
    %233 = math.exp %232 : vector<16x16xf32>
    %cst_96 = arith.constant dense<0.000000e+00> : vector<16xf32>
    %234 = vector.multi_reduction <add>, %233, %cst_96 [1] : vector<16x16xf32> to vector<16xf32>
    %235 = vector.shape_cast %234 : vector<16xf32> to vector<16x1xf32>
    %236 = tpu.reciprocal %235 {approx = true} : vector<16x1xf32> -> vector<16x1xf32>
    %237 = vector.broadcast %236 : vector<16x1xf32> to vector<16x16xf32>
    %238 = arith.mulf %233, %237 : vector<16x16xf32>
    %239 = arith.truncf %238 : vector<16x16xf32> to vector<16x16xbf16>
    %cst_97 = arith.constant dense<0.000000e+00> : vector<16x16xf32>
    %240 = tpu.matmul %239, %224, %cst_97 {dimension_numbers = #tpu.dot_dimension_numbers<[1], [0], [0], [1], [0, 0, 1, 1], [], []>} : vector<16x16xbf16>, vector<16x16xbf16>, vector<16x16xf32> -> vector<16x16xf32>
    %241 = arith.truncf %240 : vector<16x16xf32> to vector<16x16xbf16>
    %242 = vector.extract_strided_slice %182 {offsets = [16, 0], sizes = [16, 32], strides = [1, 1]} : vector<32x32xbf16> to vector<16x32xbf16>
    %cst_98 = arith.constant dense<0.000000e+00> : vector<16x32xf32>
    %243 = tpu.matmul %241, %242, %cst_98 {dimension_numbers = #tpu.dot_dimension_numbers<[1], [0], [0], [1], [0, 0, 1, 1], [], []>} : vector<16x16xbf16>, vector<16x32xbf16>, vector<16x32xf32> -> vector<16x32xf32>
    %244 = arith.addf %218, %243 : vector<16x32xf32>
    %245 = arith.addf %178, %244 : vector<16x32xf32>
    %c1_99 = arith.constant 1 : index
    %c0_100 = arith.constant 0 : index
    %c0_101 = arith.constant 0 : index
    %246 = vector.load %arg7[%c1_99, %c0_100, %c0_101] : memref<2x1x32xf32, #tpu.memory_space<vmem>>, vector<1x1x32xf32>
    %247 = vector.shape_cast %246 : vector<1x1x32xf32> to vector<1x32xf32>
    %248 = vector.broadcast %247 : vector<1x32xf32> to vector<16x32xf32>
    %249 = arith.addf %245, %248 : vector<16x32xf32>
    %c1_102 = arith.constant 1 : index
    %c0_103 = arith.constant 0 : index
    %c0_104 = arith.constant 0 : index
    %250 = vector.load %arg8[%c1_102, %c0_103, %c0_104] : memref<2x1x32xf32, #tpu.memory_space<vmem>>, vector<1x1x32xf32>
    %251 = vector.shape_cast %250 : vector<1x1x32xf32> to vector<1x32xf32>
    %c1_105 = arith.constant 1 : index
    %c0_106 = arith.constant 0 : index
    %c0_107 = arith.constant 0 : index
    %252 = vector.load %arg9[%c1_105, %c0_106, %c0_107] : memref<2x1x32xf32, #tpu.memory_space<vmem>>, vector<1x1x32xf32>
    %253 = vector.shape_cast %252 : vector<1x1x32xf32> to vector<1x32xf32>
    %cst_108 = arith.constant dense<0.000000e+00> : vector<16xf32>
    %254 = vector.multi_reduction <add>, %249, %cst_108 [1] : vector<16x32xf32> to vector<16xf32>
    %255 = vector.shape_cast %254 : vector<16xf32> to vector<16x1xf32>
    %cst_109 = arith.constant 3.200000e+01 : f32
    %256 = vector.broadcast %cst_109 : f32 to vector<16x1xf32>
    %257 = arith.divf %255, %256 : vector<16x1xf32>
    %258 = vector.broadcast %257 : vector<16x1xf32> to vector<16x32xf32>
    %259 = arith.subf %249, %258 : vector<16x32xf32>
    %260 = arith.mulf %259, %259 : vector<16x32xf32>
    %cst_110 = arith.constant dense<0.000000e+00> : vector<16xf32>
    %261 = vector.multi_reduction <add>, %260, %cst_110 [1] : vector<16x32xf32> to vector<16xf32>
    %262 = vector.shape_cast %261 : vector<16xf32> to vector<16x1xf32>
    %cst_111 = arith.constant 3.200000e+01 : f32
    %263 = vector.broadcast %cst_111 : f32 to vector<16x1xf32>
    %264 = arith.divf %262, %263 : vector<16x1xf32>
    %265 = vector.broadcast %257 : vector<16x1xf32> to vector<16x32xf32>
    %266 = arith.subf %249, %265 : vector<16x32xf32>
    %cst_112 = arith.constant 9.99999996E-13 : f32
    %267 = vector.broadcast %cst_112 : f32 to vector<16x1xf32>
    %268 = arith.addf %264, %267 : vector<16x1xf32>
    %269 = math.rsqrt %268 : vector<16x1xf32>
    %270 = vector.broadcast %269 : vector<16x1xf32> to vector<16x32xf32>
    %271 = arith.mulf %266, %270 : vector<16x32xf32>
    %272 = vector.broadcast %251 : vector<1x32xf32> to vector<16x32xf32>
    %273 = arith.mulf %271, %272 : vector<16x32xf32>
    %274 = vector.broadcast %253 : vector<1x32xf32> to vector<16x32xf32>
    %275 = arith.addf %273, %274 : vector<16x32xf32>
    %276 = arith.truncf %275 : vector<16x32xf32> to vector<16x32xbf16>
    %c1_113 = arith.constant 1 : index
    %c0_114 = arith.constant 0 : index
    %c0_115 = arith.constant 0 : index
    %277 = vector.load %arg10[%c1_113, %c0_114, %c0_115] : memref<2x32x64xbf16, #tpu.memory_space<vmem>>, vector<1x32x64xbf16>
    %278 = vector.shape_cast %277 : vector<1x32x64xbf16> to vector<32x64xbf16>
    %cst_116 = arith.constant dense<0.000000e+00> : vector<16x64xf32>
    %279 = tpu.matmul %276, %278, %cst_116 {dimension_numbers = #tpu.dot_dimension_numbers<[1], [0], [0], [1], [0, 0, 1, 1], [], []>} : vector<16x32xbf16>, vector<32x64xbf16>, vector<16x64xf32> -> vector<16x64xf32>
    %c1_117 = arith.constant 1 : index
    %c0_118 = arith.constant 0 : index
    %c0_119 = arith.constant 0 : index
    %280 = vector.load %arg11[%c1_117, %c0_118, %c0_119] : memref<2x1x64xf32, #tpu.memory_space<vmem>>, vector<1x1x64xf32>
    %281 = vector.shape_cast %280 : vector<1x1x64xf32> to vector<1x64xf32>
    %282 = vector.broadcast %281 : vector<1x64xf32> to vector<16x64xf32>
    %283 = arith.addf %279, %282 : vector<16x64xf32>
    %cst_120 = arith.constant 5.000000e-01 : f32
    %284 = vector.broadcast %cst_120 : f32 to vector<16x64xf32>
    %285 = arith.mulf %284, %283 : vector<16x64xf32>
    %cst_121 = arith.constant 4.471500e-02 : f32
    %286 = vector.broadcast %cst_121 : f32 to vector<16x64xf32>
    %287 = arith.mulf %286, %283 : vector<16x64xf32>
    %288 = arith.mulf %287, %283 : vector<16x64xf32>
    %289 = arith.mulf %288, %283 : vector<16x64xf32>
    %290 = arith.addf %283, %289 : vector<16x64xf32>
    %cst_122 = arith.constant 0.797884583 : f32
    %291 = vector.broadcast %cst_122 : f32 to vector<16x64xf32>
    %292 = arith.mulf %291, %290 : vector<16x64xf32>
    %293 = math.tanh %292 : vector<16x64xf32>
    %cst_123 = arith.constant 1.000000e+00 : f32
    %294 = vector.broadcast %cst_123 : f32 to vector<16x64xf32>
    %295 = arith.addf %294, %293 : vector<16x64xf32>
    %296 = arith.mulf %285, %295 : vector<16x64xf32>
    %297 = arith.truncf %296 : vector<16x64xf32> to vector<16x64xbf16>
    %c1_124 = arith.constant 1 : index
    %c0_125 = arith.constant 0 : index
    %c0_126 = arith.constant 0 : index
    %298 = vector.load %arg12[%c1_124, %c0_125, %c0_126] : memref<2x64x32xbf16, #tpu.memory_space<vmem>>, vector<1x64x32xbf16>
    %299 = vector.shape_cast %298 : vector<1x64x32xbf16> to vector<64x32xbf16>
    %cst_127 = arith.constant dense<0.000000e+00> : vector<16x32xf32>
    %300 = tpu.matmul %297, %299, %cst_127 {dimension_numbers = #tpu.dot_dimension_numbers<[1], [0], [0], [1], [0, 0, 1, 1], [], []>} : vector<16x64xbf16>, vector<64x32xbf16>, vector<16x32xf32> -> vector<16x32xf32>
    %c1_128 = arith.constant 1 : index
    %c0_129 = arith.constant 0 : index
    %c0_130 = arith.constant 0 : index
    %301 = vector.load %arg13[%c1_128, %c0_129, %c0_130] : memref<2x1x32xf32, #tpu.memory_space<vmem>>, vector<1x1x32xf32>
    %302 = vector.shape_cast %301 : vector<1x1x32xf32> to vector<1x32xf32>
    %303 = vector.broadcast %302 : vector<1x32xf32> to vector<16x32xf32>
    %304 = arith.addf %300, %303 : vector<16x32xf32>
    %305 = arith.addf %275, %304 : vector<16x32xf32>
    %c1_131 = arith.constant 1 : index
    %c0_132 = arith.constant 0 : index
    %c0_133 = arith.constant 0 : index
    %306 = vector.load %arg14[%c1_131, %c0_132, %c0_133] : memref<2x1x32xf32, #tpu.memory_space<vmem>>, vector<1x1x32xf32>
    %307 = vector.shape_cast %306 : vector<1x1x32xf32> to vector<1x32xf32>
    %c1_134 = arith.constant 1 : index
    %c0_135 = arith.constant 0 : index
    %c0_136 = arith.constant 0 : index
    %308 = vector.load %arg15[%c1_134, %c0_135, %c0_136] : memref<2x1x32xf32, #tpu.memory_space<vmem>>, vector<1x1x32xf32>
    %309 = vector.shape_cast %308 : vector<1x1x32xf32> to vector<1x32xf32>
    %cst_137 = arith.constant dense<0.000000e+00> : vector<16xf32>
    %310 = vector.multi_reduction <add>, %305, %cst_137 [1] : vector<16x32xf32> to vector<16xf32>
    %311 = vector.shape_cast %310 : vector<16xf32> to vector<16x1xf32>
    %cst_138 = arith.constant 3.200000e+01 : f32
    %312 = vector.broadcast %cst_138 : f32 to vector<16x1xf32>
    %313 = arith.divf %311, %312 : vector<16x1xf32>
    %314 = vector.broadcast %313 : vector<16x1xf32> to vector<16x32xf32>
    %315 = arith.subf %305, %314 : vector<16x32xf32>
    %316 = arith.mulf %315, %315 : vector<16x32xf32>
    %cst_139 = arith.constant dense<0.000000e+00> : vector<16xf32>
    %317 = vector.multi_reduction <add>, %316, %cst_139 [1] : vector<16x32xf32> to vector<16xf32>
    %318 = vector.shape_cast %317 : vector<16xf32> to vector<16x1xf32>
    %cst_140 = arith.constant 3.200000e+01 : f32
    %319 = vector.broadcast %cst_140 : f32 to vector<16x1xf32>
    %320 = arith.divf %318, %319 : vector<16x1xf32>
    %321 = vector.broadcast %313 : vector<16x1xf32> to vector<16x32xf32>
    %322 = arith.subf %305, %321 : vector<16x32xf32>
    %cst_141 = arith.constant 9.99999996E-13 : f32
    %323 = vector.broadcast %cst_141 : f32 to vector<16x1xf32>
    %324 = arith.addf %320, %323 : vector<16x1xf32>
    %325 = math.rsqrt %324 : vector<16x1xf32>
    %326 = vector.broadcast %325 : vector<16x1xf32> to vector<16x32xf32>
    %327 = arith.mulf %322, %326 : vector<16x32xf32>
    %328 = vector.broadcast %307 : vector<1x32xf32> to vector<16x32xf32>
    %329 = arith.mulf %327, %328 : vector<16x32xf32>
    %330 = vector.broadcast %309 : vector<1x32xf32> to vector<16x32xf32>
    %331 = arith.addf %329, %330 : vector<16x32xf32>
    %c0_142 = arith.constant 0 : index
    %c0_143 = arith.constant 0 : index
    %332 = vector.load %arg18[%c0_142, %c0_143] : memref<16x32xf32, #tpu.memory_space<vmem>>, vector<16x32xf32>
    tpu.vector_store %arg18[%c0_142, %c0_143], %331 {strides = array<i32>} : memref<16x32xf32, #tpu.memory_space<vmem>>, vector<16x32xf32>,
    %333 = arith.truncf %331 : vector<16x32xf32> to vector<16x32xbf16>
    %c0_144 = arith.constant 0 : index
    %c0_145 = arith.constant 0 : index
    %334 = vector.load %arg16[%c0_144, %c0_145] : memref<32x32xbf16, #tpu.memory_space<vmem>>, vector<32x32xbf16>
    %cst_146 = arith.constant dense<0.000000e+00> : vector<16x32xf32>
    %335 = tpu.matmul %333, %334, %cst_146 {dimension_numbers = #tpu.dot_dimension_numbers<[1], [0], [0], [1], [0, 0, 1, 1], [], []>} : vector<16x32xbf16>, vector<32x32xbf16>, vector<16x32xf32> -> vector<16x32xf32>
    %c0_147 = arith.constant 0 : index
    %c0_148 = arith.constant 0 : index
    %336 = vector.load %arg17[%c0_147, %c0_148] : memref<1x32xf32, #tpu.memory_space<vmem>>, vector<1x32xf32>
    %337 = vector.broadcast %336 : vector<1x32xf32> to vector<16x32xf32>
    %338 = arith.addf %335, %337 : vector<16x32xf32>
    %339 = math.tanh %338 : vector<16x32xf32>
    %340 = vector.extract_strided_slice %339 {offsets = [0, 0], sizes = [1, 32], strides = [1, 1]} : vector<16x32xf32> to vector<1x32xf32>
    %c0_149 = arith.constant 0 : index
    %c0_150 = arith.constant 0 : index
    %341 = vector.load %arg19[%c0_149, %c0_150] : memref<2x32xf32, #tpu.memory_space<vmem>>, vector<1x32xf32>
    tpu.vector_store %arg19[%c0_149, %c0_150], %340 {strides = array<i32>} : memref<2x32xf32, #tpu.memory_space<vmem>>, vector<1x32xf32>,
    %342 = vector.extract_strided_slice %339 {offsets = [8, 0], sizes = [1, 32], strides = [1, 1]} : vector<16x32xf32> to vector<1x32xf32>
    %c1_151 = arith.constant 1 : index
    %c0_152 = arith.constant 0 : index
    %343 = vector.load %arg19[%c1_151, %c0_152] : memref<2x32xf32, #tpu.memory_space<vmem>>, vector<1x32xf32>
    tpu.vector_store %arg19[%c1_151, %c0_152], %342 {strides = array<i32>} : memref<2x32xf32, #tpu.memory_space<vmem>>, vector<1x32xf32>,
    return
  }
}

</mosaic_0001>

<bundles_post_ra>
// kernel: tpu_custom_call.1
= control target key start
LH: loop header
LB: loop body
LE: loop exit
PB: predicated region body
PF: predicated region fallthrough
CT: control target
= control target key end

     0   :  { %s2771_s0 = inlined_call_operand.hbm [shape: f32[16,32], index: 0, kind: input, shape index: {}]   ;;  %s2772_s1 = inlined_call_operand.hbm [shape: f32[16,16], index: 1, kind: input, shape index: {}]   ;;  %s2773_s2 = inlined_call_operand.hbm [shape: f32[1,32], index: 2, kind: input, shape index: {}]   ;;  %s2774_s3 = inlined_call_operand.hbm [shape: f32[1,32], index: 3, kind: input, shape index: {}]   ;;  %s2775_s4 = inlined_call_operand.vmem [shape: bf16[2,32,96], index: 4, kind: input, shape index: {}]   ;;  %s2776_s5 = inlined_call_operand.hbm [shape: f32[2,1,96], index: 5, kind: input, shape index: {}]   ;;  %s2777_s6 = inlined_call_operand.vmem [shape: bf16[2,32,32], index: 6, kind: input, shape index: {}]   ;;  %s2778_s7 = inlined_call_operand.hbm [shape: f32[2,1,32], index: 7, kind: input, shape index: {}]   ;;  %s2779_s8 = inlined_call_operand.hbm [shape: f32[2,1,32], index: 8, kind: input, shape index: {}]   ;;  %s2780_s9 = inlined_call_operand.hbm [shape: f32[2,1,32], index: 9, kind: input, shape index: {}]   ;;  %s2781_s10 = inlined_call_operand.vmem [shape: bf16[2,32,64], index: 10, kind: input, shape index: {}]   ;;  %s2782_s11 = inlined_call_operand.vmem [shape: f32[2,1,64], index: 11, kind: input, shape index: {}]   ;;  %s2783_s12 = inlined_call_operand.vmem [shape: bf16[2,64,32], index: 12, kind: input, shape index: {}]   ;;  %s2784_s13 = inlined_call_operand.vmem [shape: f32[2,1,32], index: 13, kind: input, shape index: {}]   ;;  %s2785_s14 = inlined_call_operand.vmem [shape: f32[2,1,32], index: 14, kind: input, shape index: {}]   ;;  %s2786_s15 = inlined_call_operand.vmem [shape: f32[2,1,32], index: 15, kind: input, shape index: {}]   ;;  %s2787_s16 = inlined_call_operand.vmem [shape: bf16[32,32], index: 16, kind: input, shape index: {}]   ;;  %s2788_s17 = inlined_call_operand.vmem [shape: f32[1,32], index: 17, kind: input, shape index: {}]   ;;  %s2789_s18 = inlined_call_operand.hbm [shape: f32[16,32], index: 18, kind: output, shape index: {0}]   ;;  %s2790_s19 = inlined_call_operand.hbm [shape: f32[2,32], index: 19, kind: output, shape index: {1}]  }
   0x1   :  { %2791 = sst [smem:[#allocation26_spill]] %s2771_s0 }
   0x2   :  { %2792 = sst [smem:[#allocation27_spill]] %s2772_s1 }
   0x3   :  { %2793 = sst [smem:[#allocation28_spill]] %s2773_s2 }
   0x4   :  { %2794 = sst [smem:[#allocation29_spill]] %s2774_s3 }
   0x5   :  { %2795 = sst [smem:[#allocation30_spill]] %s2790_s19 }
   0x6   :  { %25 = vsyncpa [#allocation3], 0 }
   0x7   :  { %26 = vsyncpa [#allocation6], 0 }
   0x8   :  { %27 = vsyncpa [#allocation9], 0 }
   0x9   :  { %28 = vsyncpa [#allocation12], 0 }
   0xa   :  { %29 = vsyncpa [#allocation15], 0 }
   0xb   :  { %30 = vsyncpa [#allocation4], 0 }
   0xc   :  { %31 = vsyncpa [#allocation18], 0  ;;  %s2323_s0 = smov [#allocation5]   ;;  %s2324_s20 = smov [#allocation8]  }
   0xd   :  { %s49_s30 = sshll.u32 %s2323_s0, 4  ;;  %s72_s21 = sshll.u32 %s2324_s20, 4  ;;  %s50_s30 = int_to_ptr.vmem [resolvable:$true] %s49_s30  ;;  %s73_s21 = int_to_ptr.vmem [resolvable:$true] %s72_s21 }
   0xe   :  { %s2117_s1 = scalar_lea.vmem %s50_s30, 256  ;;  %p2122_p1 = scmp.lt.s32.totalorder %s50_s30, %s50_s30 }
   0xf   :  { %p2118_p0 = scmp.ne.s32.totalorder %s50_s30, %s2117_s1  ;;  %p2123_p2 = scmp.lt.s32.totalorder %s2117_s1, %s2117_s1 }
  0x11   :  { %p2124_p3 = por %p2123_p2, %p2122_p1 }
  0x13   :  { %p2125_p4 = pnand %p2124_p3, %p2118_p0 }
  0x15   :  { %2128 = shalt.err (!%p2125_p4)
}
  0x16   :  { %s2325_s22 = smov 128   ;;  %s2326_s2 = smov 8  }
  0x17   :  { %s2796_s25 = sld [smem:[#allocation27_spill]]  ;;  %s2137_s3 = scalar_lea.vmem %s73_s21, 16 }
  0x18   :  { %p2138_p5 = scmp.ne.s32.totalorder %s73_s21, %s2137_s3  ;;  %s2141_s26 = scalar_lea.vmem %s73_s21, 32 }
  0x19   :  { %p2142_p6 = scmp.lt.s32.totalorder %s73_s21, %s73_s21  ;;  %p2143_p7 = scmp.lt.s32.totalorder %s2141_s26, %s2137_s3 }
  0x1b   :  { %p2144_p8 = por %p2143_p7, %p2142_p6 }
  0x1d   :  { %55 = dma.hbm_to_vmem [thread:$0]  %s2796_s25, 256, %s50_s30, [#allocation6], %s2325_s22, %s2325_s22, %s2326_s2  }
  0x1e   :  { %p2145_p9 = pnand %p2144_p8, %p2138_p5 }
  0x20   :  { %2148 = shalt.err (!%p2145_p9)
}
  0x21   :  { %s2797_s29 = sld [smem:[#allocation29_spill]]  ;;  %s2327_s0 = smov [#allocation11]  }
  0x22   :  { %s97_s20 = sshll.u32 %s2327_s0, 4  ;;  %s2328_s1 = smov [#allocation2]   ;;  %s98_s20 = int_to_ptr.vmem [resolvable:$true] %s97_s20 }
  0x23   :  { %s37_s19 = sshll.u32 %s2328_s1, 4  ;;  %s2157_s23 = scalar_lea.vmem %s98_s20, 32  ;;  %s38_s19 = int_to_ptr.vmem [resolvable:$true] %s37_s19 }
  0x24   :  { %p2158_p10 = scmp.ne.s32.totalorder %s98_s20, %s2157_s23  ;;  %p2162_p11 = scmp.lt.s32.totalorder %s98_s20, %s98_s20 }
  0x25   :  { %p2163_p12 = scmp.lt.s32.totalorder %s2157_s23, %s2157_s23 }
  0x27   :  { %75 = dma.hbm_to_vmem [thread:$0]  %s2797_s29, 16, %s73_s21, [#allocation9]  }
  0x28   :  { %p2164_p13 = por %p2163_p12, %p2162_p11 }
  0x2a   :  { %p2165_p0 = pnand %p2164_p13, %p2158_p10 }
  0x2c   :  { %2168 = shalt.err (!%p2165_p0)
}
  0x2d   :  { %s2329_s30 = smov 16   ;;  %s2330_s24 = smov 1  }
  0x2e   :  { %103 = dma.hbm_to_vmem [thread:$0]  %s2778_s7, 32, %s98_s20, [#allocation12], %s2329_s30, %s2329_s30, %s2330_s24  }
  0x2f   :  { %s2177_s3 = scalar_lea.vmem %s38_s19, 256  ;;  %p2182_p2 = scmp.lt.s32.totalorder %s38_s19, %s38_s19 }
  0x30   :  { %p2178_p1 = scmp.ne.s32.totalorder %s38_s19, %s2177_s3  ;;  %p2183_p3 = scmp.lt.s32.totalorder %s2177_s3, %s2177_s3 }
  0x32   :  { %p2184_p4 = por %p2183_p3, %p2182_p2 }
  0x34   :  { %p2185_p5 = pnand %p2184_p4, %p2178_p1 }
  0x36   :  { %2188 = shalt.err (!%p2185_p5)
}
  0x37   :  { %s2798_s28 = sld [smem:[#allocation26_spill]]  ;;  %s2331_s29 = smov [#allocation7]  }
  0x38   :  { %s62_s0 = sshll.u32 %s2331_s29, 4  ;;  %s2332_s1 = smov [#allocation10]   ;;  %s63_s0 = int_to_ptr.vmem [resolvable:$true] %s62_s0 }
  0x39   :  { %s83_s23 = sshll.u32 %s2332_s1, 4  ;;  %s2197_s7 = scalar_lea.vmem %s63_s0, 16  ;;  %s84_s23 = int_to_ptr.vmem [resolvable:$true] %s83_s23 }
  0x3a   :  { %p2198_p6 = scmp.ne.s32.totalorder %s63_s0, %s2197_s7  ;;  %s2201_s20 = scalar_lea.vmem %s63_s0, 32 }
  0x3b   :  { %p2202_p7 = scmp.lt.s32.totalorder %s63_s0, %s63_s0  ;;  %p2203_p8 = scmp.lt.s32.totalorder %s2201_s20, %s2197_s7 }
  0x3d   :  { %43 = dma.hbm_to_vmem [thread:$0]  %s2798_s28, 256, %s38_s19, [#allocation3], %s2325_s22, %s2325_s22, %s2326_s2  }
  0x3e   :  { %p2204_p9 = por %p2203_p8, %p2202_p7 }
  0x40   :  { %p2205_p10 = pnand %p2204_p9, %p2198_p6 }
  0x42   :  { %2208 = shalt.err (!%p2205_p10)
}
  0x43   :  { %s2799_s3 = sld [smem:[#allocation28_spill]]  ;;  %s2217_s26 = scalar_lea.vmem %s84_s23, 32 }
  0x44   :  { %p2218_p11 = scmp.ne.s32.totalorder %s84_s23, %s2217_s26  ;;  %p2222_p12 = scmp.lt.s32.totalorder %s84_s23, %s84_s23 }
  0x45   :  { %p2223_p13 = scmp.lt.s32.totalorder %s2217_s26, %s2217_s26 }
  0x47   :  { %p2224_p0 = por %p2223_p13, %p2222_p12 }
  0x49   :  { %65 = dma.hbm_to_vmem [thread:$0]  %s2799_s3, 16, %s63_s0, [#allocation6]  }
  0x4a   :  { %p2225_p1 = pnand %p2224_p0, %p2218_p11 }
  0x4c   :  { %2228 = shalt.err (!%p2225_p1)
}
  0x4d   :  { %89 = dma.hbm_to_vmem [thread:$0]  %s2776_s5, 32, %s84_s23, [#allocation9], %s2329_s30, %s2329_s30, %s2330_s24  }
  0x4e   :  { %s2333_s28 = smov [#allocation13]   ;;  %s2334_s1 = smov [#allocation14]  }
  0x4f   :  { %s109_s29 = sshll.u32 %s2333_s28, 4  ;;  %s121_s7 = sshll.u32 %s2334_s1, 4  ;;  %s110_s29 = int_to_ptr.vmem [resolvable:$true] %s109_s29  ;;  %s122_s7 = int_to_ptr.vmem [resolvable:$true] %s121_s7 }
  0x50   :  { %s2237_s0 = scalar_lea.vmem %s110_s29, 32  ;;  %p2242_p3 = scmp.lt.s32.totalorder %s110_s29, %s110_s29 }
  0x51   :  { %p2238_p2 = scmp.ne.s32.totalorder %s110_s29, %s2237_s0  ;;  %p2243_p4 = scmp.lt.s32.totalorder %s2237_s0, %s2237_s0 }
  0x53   :  { %p2244_p5 = por %p2243_p4, %p2242_p3 }
  0x55   :  { %p2245_p6 = pnand %p2244_p5, %p2238_p2 }
  0x57   :  { %2248 = shalt.err (!%p2245_p6)
}
  0x58   :  { %115 = dma.hbm_to_vmem [thread:$0]  %s2779_s8, 32, %s110_s29, [#allocation12], %s2329_s30, %s2329_s30, %s2330_s24  }
  0x59   :  { %s2257_s5 = scalar_lea.vmem %s122_s7, 32  ;;  %p2262_p8 = scmp.lt.s32.totalorder %s122_s7, %s122_s7 }
  0x5a   :  { %p2258_p7 = scmp.ne.s32.totalorder %s122_s7, %s2257_s5  ;;  %p2263_p9 = scmp.lt.s32.totalorder %s2257_s5, %s2257_s5 }
  0x5c   :  { %p2264_p10 = por %p2263_p9, %p2262_p8 }
  0x5e   :  { %p2265_p11 = pnand %p2264_p10, %p2258_p7 }
  0x60   :  { %2268 = shalt.err (!%p2265_p11)
}
  0x61   :  { %127 = dma.hbm_to_vmem [thread:$0]  %s2780_s9, 32, %s122_s7, [#allocation15], %s2329_s30, %s2329_s30, %s2330_s24  }
  0x62   :  { %2309 = dma.done.wait [#allocation3], 256  }
  0x63   :  { %2310 = vsyncadd [#allocation3], 4294967040 }
  0x64   :  { %2311 = dma.done.wait [#allocation6], 272  }
  0x65   :  { %2312 = vsyncadd [#allocation6], 4294967024 }
  0x66   :  { %2313 = dma.done.wait [#allocation9], 48  }
  0x67   :  { %2314 = vsyncadd [#allocation9], 4294967248 }
  0x68   :  { %2315 = dma.done.wait [#allocation12], 64  }
  0x69   :  { %2316 = vsyncadd [#allocation12], 4294967232 }
  0x6a   :  { %2317 = dma.done.wait [#allocation15], 32  }
  0x6b   :  { %2318 = vsyncadd [#allocation15], 4294967264  ;;  %vm173_vm0 = vcmask 261120   ;;  %v169_v0 = vld [vmem:[#allocation2] sm:$0xff]  ;;  %v170_v1 = vld [vmem:[#allocation2 + $0x8] sm:$0xff]  ;;  %v2335_v15 = vmov 0.0  }
  0x6c   :  { %v174_v2 = vsel %vm173_vm0, %v169_v0, 0.0  ;;  %v177_v3 = vsel %vm173_vm0, %v170_v1, 0.0  ;;  %v2023_v14 = vld [vmem:[%s2775_s4 + $0x8] sm:$0xff]   ;;  %1866 = vmatprep.subr.bf16.mxu0 %v2335_v15  ;;  %vm2336_vm1 = vmmov 0   ;;  %v2024_v16 = vld [vmem:[%s2775_s4] sm:$0xff]   ;;  %1874 = vmatprep.subr.bf16.mxu1 %v2335_v15  ;;  %s2337_s3 = smov 80  }
  0x6d   :  { %175 = vadd.xlane.f32.xlu0 %v174_v2  ;;  %1870 = vmatprep.mubr.msk.bf16.mxu0 %vm2336_vm1, %v2335_v15  ;;  %v1733_v25 = vld [vmem:[#allocation7] ss:$0 sm:$0xff]  ;;  %v1734_v29 = vld [vmem:[#allocation8] ss:$0 sm:$0xff]  ;;  %v1735_v35 = vld [vmem:[#allocation10] ss:$0 sm:$0xff] }
  0x6e   :  { %1867 = vmatpush3.bf16.msra.mxu0 %v2023_v14  ;;  %1876 = vmatprep.mubr.msk.bf16.mxu1 %vm2336_vm1, %v2335_v15  ;;  %s2338_s26 = smov 96   ;;  %s2339_s19 = smov 112   ;;  %vm295_vm2 = vcmask 130048   ;;  %v2532_v48 = vld [vmem:[#allocation5] sm:$0xff]  ;;  %v2535_v53 = vld [vmem:[#allocation5 + $0x8] sm:$0xff]  ;;  %vm825_vm3 = vcmask 523264  }
  0x6f   :  { %1868 = vmatprep.subr.bf16.mxu0 %v2335_v15  ;;  %s2340_s27 = smov 64   ;;  %s2341_s28 = smov 48  }
  0x71   :  { %178 = vadd.xlane.f32.xlu0 %v177_v3 }
  0x72   :  { %1869 = vmatpush3.bf16.msra.mxu0 %v2024_v16 }
  0x73   :  { %1880 = vmatprep.subr.bf16.mxu0 %v2335_v15 }
  0xf6   :  { %v176_v4 = vpop.xlane.xlu0 %175 }
  0xf7   :  { %v181_v5 = vmul.f32 0.03125, %v176_v4 }
  0xf9   :  { %v183_v6 = vsub.f32 %v169_v0, %v181_v5 }
  0xfa   :  { %v179_v7 = vpop.xlane.xlu0 %178 }
  0xfb   :  { %v182_v8 = vmul.f32 0.03125, %v179_v7  ;;  %v185_v9 = vmul.f32 %v183_v6, %v183_v6 }
  0xfd   :  { %v184_v10 = vsub.f32 %v170_v1, %v182_v8  ;;  %v187_v11 = vsel %vm173_vm0, %v185_v9, 0.0 }
  0xfe   :  { %188 = vadd.xlane.f32.xlu1 %v187_v11 }
  0xff   :  { %v186_v12 = vmul.f32 %v184_v10, %v184_v10 }
 0x101   :  { %v190_v13 = vsel %vm173_vm0, %v186_v12, 0.0 }
 0x102   :  { %191 = vadd.xlane.f32.xlu1 %v190_v13 }
 0x187   :  { %v189_v17 = vpop.xlane.xlu1 %188 }
 0x188   :  { %v193_v18 = vmul.f32 0.03125, %v189_v17 }
 0x18a   :  { %v195_v19 = vadd.f32 1e-12, %v193_v18 }
 0x18b   :  { %v192_v20 = vpop.xlane.xlu1 %191 }
 0x18c   :  { %2045 = vrsqrt.f32 %v195_v19  ;;  %v194_v21 = vmul.f32 0.03125, %v192_v20 }
 0x18e   :  { %v196_v22 = vadd.f32 1e-12, %v194_v21 }
 0x190   :  { %2047 = vrsqrt.f32 %v196_v22 }
 0x199   :  { %v2046_v23 = vpop.eup %2045 }
 0x19a   :  { %v199_v24 = vmul.f32 %v2046_v23, %v183_v6 }
 0x19c   :  { %v207_v28 = vmul.f32 %v1733_v25, %v199_v24 }
 0x19d   :  { %v2048_v26 = vpop.eup %2047 }
 0x19e   :  { %v200_v27 = vmul.f32 %v2048_v26, %v184_v10  ;;  %v2504_v31 = vadd.f32 %v1734_v29, %v207_v28 }
 0x1a0   :  { %v208_v30 = vmul.f32 %v1733_v25, %v200_v27 }
 0x1a2   :  { %v2506_v32 = vadd.f32 %v1734_v29, %v208_v30 }
 0x1a4   :  { %v227_v33 = vpack.c.bf16 %v2506_v32, %v2504_v31 }
 0x1a6   :  { %1871 = vmatmul.mubr.msk.bf16.vlgmr.msra.gmra.mxu0 %vm173_vm0, %v227_v33 }
 0x1a7   :  { %1882 = vmatprep.mubr.msk.bf16.mxu0 %vm2336_vm1, %v2335_v15 }
 0x266   :  { %v284_v34 = vpop.f32.mrf.mxu0 }
 0x267   :  { %v285_v38 = vadd.f32 %v1735_v35, %v284_v34 }
 0x268   :  { %v1872_v36 = vpop.f32.mrf.mxu0 }
 0x26a   :  { %v287_v37 = vpop.f32.mrf.mxu0 }
 0x26b   :  { %v288_v39 = vadd.f32 %v1735_v35, %v287_v37 }
 0x26c   :  { %v1873_v40 = vpop.f32.mrf.mxu0 }
 0x26d   :  { %v2513_v41 = vpack.c.bf16 %v288_v39, %v285_v38 }
 0x26f   :  { %420 = vrot.lane.b32.xlu1 %v2513_v41, %s2337_s3  ;;  %293 = vrot.lane.b32.xlu0 %v2513_v41, %s2338_s26 }
 0x273   :  { %418 = vrot.lane.b32.xlu1 %v2513_v41, %s2339_s19 }
 0x2e1   :  { %v294_v42 = vpop.permute.xlu0 %293  ;;  %v421_v44 = vpop.permute.xlu1 %420 }
 0x2e2   :  { %v300_v43 = vsel %vm295_vm2, %v294_v42, 0  ;;  %v426_v45 = vsel %vm295_vm2, %v421_v44, 0  ;;  %v2025_v44 = vld [vmem:[%s2777_s6] sm:$0xff]  }
 0x2e3   :  { %1875 = vmatpush3.bf16.xpose.msra.mxu1 %v300_v43 }
 0x2e4   :  { %1886 = vmatprep.subr.bf16.mxu1 %v2335_v15 }
 0x2e5   :  { %v419_v46 = vpop.permute.xlu1 %418 }
 0x2ea   :  { %1877 = vmatmul.mubr.msk.bf16.vlgmr.msra.gmra.mxu1 %vm295_vm2, %v2513_v41 }
 0x2eb   :  { %1887 = vmatpush3.bf16.xpose.msra.mxu1 %v426_v45  ;;  %1888 = vmatprep.mubr.msk.bf16.mxu1 %vm2336_vm1, %v2335_v15  ;;  %v2026_v45 = vld [vmem:[%s2777_s6 + $0x8] sm:$0xff]  }
 0x2ec   :  { %1898 = vmatprep.subr.bf16.mxu1 %v2335_v15 }
 0x2f2   :  { %1889 = vmatmul.mubr.msk.bf16.vlgmr.msra.gmra.mxu1 %vm295_vm2, %v419_v46 }
 0x2f3   :  { %1900 = vmatprep.mubr.msk.bf16.mxu1 %vm2336_vm1, %v2335_v15  ;;  %1899 = vmatpush3.bf16.msra.mxu1 %v2026_v45  ;;  %v1750_v45 = vld [vmem:[%s2782_s11] ss:$0 sm:$0xff] }
 0x2f4   :  { %1910 = vmatprep.subr.bf16.mxu1 %v2335_v15 }
 0x3aa   :  { %v336_v47 = vpop.f32.mrf.mxu1 }
 0x3ab   :  { %v343_v49 = vmul.f32 0.25, %v336_v47 }
 0x3ac   :  { %v1878_v50 = vpop.f32.mrf.mxu1 }
 0x3ad   :  { %v345_v51 = vadd.f32 %v343_v49, %v2532_v48 }
 0x3ae   :  { %v339_v52 = vpop.f32.mrf.mxu1 }
 0x3af   :  { %v344_v54 = vmul.f32 0.25, %v339_v52  ;;  %v347_v55 = vsel %vm295_vm2, %v345_v51, -inf }
 0x3b0   :  { %348 = vmax.xlane.f32.xlu1 %v347_v55  ;;  %v1879_v56 = vpop.f32.mrf.mxu1 }
 0x3b1   :  { %v346_v57 = vadd.f32 %v344_v54, %v2535_v53 }
 0x3b2   :  { %v462_v58 = vpop.f32.mrf.mxu1 }
 0x3b3   :  { %v469_v59 = vmul.f32 0.25, %v462_v58  ;;  %v350_v60 = vsel %vm295_vm2, %v346_v57, -inf }
 0x3b4   :  { %351 = vmax.xlane.f32.xlu0 %v350_v60  ;;  %v1890_v61 = vpop.f32.mrf.mxu1 }
 0x3b5   :  { %v471_v62 = vadd.f32 %v469_v59, %v2532_v48 }
 0x3b6   :  { %v465_v63 = vpop.f32.mrf.mxu1 }
 0x3b7   :  { %v470_v0 = vmul.f32 0.25, %v465_v63  ;;  %v473_v1 = vsel %vm295_vm2, %v471_v62, -inf }
 0x3b8   :  { %474 = vmax.xlane.f32.xlu0 %v473_v1  ;;  %v1891_v2 = vpop.f32.mrf.mxu1  ;;  %v1747_v1 = vld [vmem:[#allocation11] ss:$0 sm:$0xff] }
 0x3b9   :  { %v472_v3 = vadd.f32 %v470_v0, %v2535_v53 }
 0x3bb   :  { %v476_v4 = vsel %vm295_vm2, %v472_v3, -inf }
 0x3bc   :  { %477 = vmax.xlane.f32.xlu0 %v476_v4 }
 0x439   :  { %v349_v5 = vpop.xlane.xlu1 %348 }
 0x43a   :  { %v353_v6 = vsub.f32 %v345_v51, %v349_v5 }
 0x43c   :  { %v355_v7 = vmul.f32 1.442695, %v353_v6 }
 0x43d   :  { %v352_v8 = vpop.xlane.xlu0 %351 }
 0x43e   :  { %2049 = vpow2.f32 %v355_v7  ;;  %v354_v9 = vsub.f32 %v346_v57, %v352_v8 }
 0x440   :  { %v357_v10 = vmul.f32 1.442695, %v354_v9 }
 0x441   :  { %v475_v11 = vpop.xlane.xlu0 %474 }
 0x442   :  { %2051 = vpow2.f32 %v357_v10  ;;  %v479_v12 = vsub.f32 %v471_v62, %v475_v11 }
 0x444   :  { %v481_v13 = vmul.f32 1.442695, %v479_v12 }
 0x445   :  { %v478_v14 = vpop.xlane.xlu0 %477 }
 0x446   :  { %2053 = vpow2.f32 %v481_v13  ;;  %v480_v16 = vsub.f32 %v472_v3, %v478_v14 }
 0x448   :  { %v483_v17 = vmul.f32 1.442695, %v480_v16 }
 0x44a   :  { %2055 = vpow2.f32 %v483_v17 }
 0x44b   :  { %v2050_v18 = vpop.eup %2049 }
 0x44c   :  { %v359_v19 = vsel %vm295_vm2, %v2050_v18, 0.0 }
 0x44d   :  { %360 = vadd.xlane.f32.xlu1 %v359_v19 }
 0x44f   :  { %v2052_v20 = vpop.eup %2051 }
 0x450   :  { %v362_v21 = vsel %vm295_vm2, %v2052_v20, 0.0 }
 0x451   :  { %363 = vadd.xlane.f32.xlu0 %v362_v21  ;;  %v2028_v21 = vld [vmem:[%s2781_s10] sm:$0xff]  }
 0x453   :  { %v2054_v22 = vpop.eup %2053 }
 0x454   :  { %v485_v23 = vsel %vm295_vm2, %v2054_v22, 0.0 }
 0x455   :  { %486 = vadd.xlane.f32.xlu1 %v485_v23 }
 0x457   :  { %v2056_v24 = vpop.eup %2055 }
 0x458   :  { %v488_v25 = vsel %vm295_vm2, %v2056_v24, 0.0 }
 0x459   :  { %489 = vadd.xlane.f32.xlu0 %v488_v25 }
 0x466   :  { %370 = vrot.lane.b32.xlu1 %v2513_v41, %s2340_s27 }
 0x46f   :  { %496 = vrot.lane.b32.xlu0 %v2513_v41, %s2341_s28 }
 0x4d6   :  { %v361_v26 = vpop.xlane.xlu1 %360 }
 0x4d7   :  { %2057 = vrcp.f32 %v361_v26 }
 0x4da   :  { %v364_v27 = vpop.xlane.xlu0 %363 }
 0x4db   :  { %2059 = vrcp.f32 %v364_v27 }
 0x4de   :  { %v487_v28 = vpop.xlane.xlu1 %486 }
 0x4df   :  { %2061 = vrcp.f32 %v487_v28 }
 0x4e2   :  { %v371_v29 = vpop.permute.xlu1 %370  ;;  %v490_v30 = vpop.xlane.xlu0 %489 }
 0x4e3   :  { %2063 = vrcp.f32 %v490_v30  ;;  %1881 = vmatpush3.bf16.msra.mxu0 %v371_v29  ;;  %v1748_v30 = vld [vmem:[#allocation13] ss:$0 sm:$0xff] }
 0x4e4   :  { %1892 = vmatprep.subr.bf16.mxu0 %v2335_v15  ;;  %v2058_v33 = vpop.eup %2057 }
 0x4e5   :  { %v367_v35 = vmul.f32 %v2058_v33, %v2050_v18 }
 0x4e6   :  { %v497_v38 = vpop.permute.xlu0 %496 }
 0x4e8   :  { %v2060_v34 = vpop.eup %2059 }
 0x4e9   :  { %v368_v36 = vmul.f32 %v2060_v34, %v2052_v20  ;;  %v2027_v20 = vld [vmem:[%s2781_s10 + $0x8] sm:$0xff]  }
 0x4eb   :  { %v369_v37 = vpack.c.bf16 %v368_v36, %v367_v35  ;;  %v1749_v36 = vld [vmem:[#allocation14] ss:$0 sm:$0xff] }
 0x4ec   :  { %v2062_v39 = vpop.eup %2061 }
 0x4ed   :  { %1883 = vmatmul.mubr.msk.bf16.vlgmr.msra.gmra.mxu0 %vm295_vm2, %v369_v37  ;;  %v493_v41 = vmul.f32 %v2062_v39, %v2054_v22 }
 0x4ee   :  { %1893 = vmatpush3.bf16.msra.mxu0 %v497_v38  ;;  %1894 = vmatprep.mubr.msk.bf16.mxu0 %vm2336_vm1, %v2335_v15 }
 0x4ef   :  { %1904 = vmatprep.subr.bf16.mxu0 %v2335_v15 }
 0x4f0   :  { %v2064_v40 = vpop.eup %2063 }
 0x4f1   :  { %v494_v42 = vmul.f32 %v2064_v40, %v2056_v24 }
 0x4f3   :  { %v495_v43 = vpack.c.bf16 %v494_v42, %v493_v41  ;;  %v2029_v41 = vld [vmem:[%s2783_s12 + $0x18] sm:$0xff]   ;;  %v2030_v42 = vld [vmem:[%s2783_s12 + $0x10] sm:$0xff]  }
 0x4f5   :  { %1895 = vmatmul.mubr.msk.bf16.vlgmr.msra.gmra.mxu0 %vm295_vm2, %v495_v43  ;;  %v2031_v43 = vld [vmem:[%s2783_s12 + $0x8] sm:$0xff]  }
 0x4f6   :  { %1906 = vmatprep.mubr.msk.bf16.mxu0 %vm2336_vm1, %v2335_v15  ;;  %1905 = vmatpush3.bf16.msra.mxu0 %v2025_v44  ;;  %v2032_v44 = vld [vmem:[%s2783_s12] sm:$0xff]  }
 0x4f7   :  { %1918 = vmatprep.subr.bf16.mxu0 %v2335_v15 }
 0x5ad   :  { %v410_v46 = vpop.f32.mrf.mxu0 }
 0x5af   :  { %v1884_v47 = vpop.f32.mrf.mxu0 }
 0x5b1   :  { %v413_v49 = vpop.f32.mrf.mxu0 }
 0x5b2   :  { %v417_v50 = vpack.c.bf16 %v413_v49, %v410_v46 }
 0x5b3   :  { %v1885_v51 = vpop.f32.mrf.mxu0 }
 0x5b4   :  { %1907 = vmatmul.mubr.msk.bf16.vlgmr.msra.gmra.mxu0 %vm295_vm2, %v417_v50 }
 0x5b5   :  { %v536_v52 = vpop.f32.mrf.mxu0  ;;  %1926 = vmatprep.mubr.msk.bf16.mxu0 %vm2336_vm1, %v2335_v15  ;;  %1919 = vmatpush3.bf16.msra.mxu0 %v2029_v41  ;;  %v1760_v41 = vld [vmem:[%s2785_s14] ss:$0 sm:$0xff] }
 0x5b6   :  { %1920 = vmatprep.subr.bf16.mxu0 %v2335_v15 }
 0x5b7   :  { %v1896_v54 = vpop.f32.mrf.mxu0 }
 0x5b9   :  { %v539_v55 = vpop.f32.mrf.mxu0  ;;  %1921 = vmatpush3.bf16.msra.mxu0 %v2030_v42 }
 0x5ba   :  { %v543_v56 = vpack.c.bf16 %v539_v55, %v536_v52  ;;  %1922 = vmatprep.subr.bf16.mxu0 %v2335_v15 }
 0x5bb   :  { %v1897_v57 = vpop.f32.mrf.mxu0 }
 0x5bc   :  { %1901 = vmatmul.mubr.msk.bf16.vlgmr.msra.gmra.mxu1 %vm295_vm2, %v543_v56 }
 0x5bd   :  { %1914 = vmatprep.mubr.msk.bf16.mxu1 %vm2336_vm1, %v2335_v15  ;;  %1911 = vmatpush3.bf16.msra.mxu1 %v2027_v20 }
 0x5be   :  { %1912 = vmatprep.subr.bf16.mxu1 %v2335_v15  ;;  %1923 = vmatpush3.bf16.msra.mxu0 %v2031_v43 }
 0x5bf   :  { %1924 = vmatprep.subr.bf16.mxu0 %v2335_v15 }
 0x5c1   :  { %1913 = vmatpush3.bf16.msra.mxu1 %v2028_v21 }
 0x5c2   :  { %1930 = vmatprep.subr.bf16.mxu1 %v2335_v15  ;;  %1925 = vmatpush3.bf16.msra.mxu0 %v2032_v44 }
 0x5c3   :  { %1944 = vmatprep.subr.bf16.mxu0 %v2335_v15 }
 0x674   :  { %v637_v58 = vpop.f32.mrf.mxu0 }
 0x676   :  { %v1908_v59 = vpop.f32.mrf.mxu0 }
 0x678   :  { %v640_v60 = vpop.f32.mrf.mxu0 }
 0x67a   :  { %v1909_v61 = vpop.f32.mrf.mxu0 }
 0x67c   :  { %v587_v62 = vpop.f32.mrf.mxu1 }
 0x67d   :  { %v638_v63 = vadd.f32 %v637_v58, %v587_v62 }
 0x67e   :  { %v1902_v0 = vpop.f32.mrf.mxu1 }
 0x67f   :  { %v644_v2 = vadd.f32 %v638_v63, %v2504_v31 }
 0x680   :  { %v590_v3 = vpop.f32.mrf.mxu1 }
 0x681   :  { %v641_v4 = vadd.f32 %v640_v60, %v590_v3  ;;  %v653_v5 = vadd.f32 %v1747_v1, %v644_v2 }
 0x682   :  { %v1903_v6 = vpop.f32.mrf.mxu1 }
 0x683   :  { %v645_v7 = vadd.f32 %v641_v4, %v2506_v32  ;;  %v657_v8 = vsel %vm173_vm0, %v653_v5, 0.0 }
 0x684   :  { %658 = vadd.xlane.f32.xlu1 %v657_v8 }
 0x685   :  { %v654_v9 = vadd.f32 %v1747_v1, %v645_v7 }
 0x687   :  { %v660_v10 = vsel %vm173_vm0, %v654_v9, 0.0 }
 0x688   :  { %661 = vadd.xlane.f32.xlu0 %v660_v10 }
 0x70d   :  { %v659_v11 = vpop.xlane.xlu1 %658 }
 0x70e   :  { %v663_v12 = vmul.f32 0.03125, %v659_v11 }
 0x710   :  { %v665_v13 = vsub.f32 %v653_v5, %v663_v12 }
 0x711   :  { %v662_v14 = vpop.xlane.xlu0 %661 }
 0x712   :  { %v664_v16 = vmul.f32 0.03125, %v662_v14  ;;  %v667_v17 = vmul.f32 %v665_v13, %v665_v13 }
 0x714   :  { %v666_v31 = vsub.f32 %v654_v9, %v664_v16  ;;  %v669_v18 = vsel %vm173_vm0, %v667_v17, 0.0  ;;  %v1754_v9 = vld [vmem:[%s2784_s13] ss:$0 sm:$0xff] }
 0x715   :  { %670 = vadd.xlane.f32.xlu1 %v669_v18 }
 0x716   :  { %v668_v19 = vmul.f32 %v666_v31, %v666_v31 }
 0x718   :  { %v672_v32 = vsel %vm173_vm0, %v668_v19, 0.0 }
 0x719   :  { %673 = vadd.xlane.f32.xlu0 %v672_v32 }
 0x79e   :  { %v671_v22 = vpop.xlane.xlu1 %670 }
 0x79f   :  { %v675_v23 = vmul.f32 0.03125, %v671_v22 }
 0x7a1   :  { %v677_v24 = vadd.f32 1e-12, %v675_v23 }
 0x7a2   :  { %v674_v25 = vpop.xlane.xlu0 %673 }
 0x7a3   :  { %2065 = vrsqrt.f32 %v677_v24  ;;  %v676_v26 = vmul.f32 0.03125, %v674_v25 }
 0x7a5   :  { %v678_v27 = vadd.f32 1e-12, %v676_v26 }
 0x7a7   :  { %2067 = vrsqrt.f32 %v678_v27 }
 0x7b0   :  { %v2066_v28 = vpop.eup %2065 }
 0x7b1   :  { %v681_v29 = vmul.f32 %v2066_v28, %v665_v13 }
 0x7b3   :  { %v689_v35 = vmul.f32 %v1748_v30, %v681_v29  ;;  %v2033_v29 = vld [vmem:[%s2775_s4 + $0x18] sm:$0xff]  }
 0x7b4   :  { %v2068_v33 = vpop.eup %2067 }
 0x7b5   :  { %v682_v34 = vmul.f32 %v2068_v33, %v666_v31  ;;  %v697_v38 = vadd.f32 %v1749_v36, %v689_v35 }
 0x7b7   :  { %v690_v37 = vmul.f32 %v1748_v30, %v682_v34  ;;  %v2034_v30 = vld [vmem:[%s2775_s4 + $0x10] sm:$0xff]  }
 0x7b9   :  { %v698_v39 = vadd.f32 %v1749_v36, %v690_v37 }
 0x7bb   :  { %v699_v40 = vpack.c.bf16 %v698_v39, %v697_v38 }
 0x7bd   :  { %1915 = vmatmul.mubr.msk.bf16.vlgmr.msra.gmra.mxu1 %vm173_vm0, %v699_v40 }
 0x7be   :  { %1934 = vmatprep.mubr.msk.bf16.mxu1 %vm2336_vm1, %v2335_v15  ;;  %1931 = vmatpush3.bf16.msra.mxu1 %v2033_v29 }
 0x7bf   :  { %1932 = vmatprep.subr.bf16.mxu1 %v2335_v15 }
 0x7c2   :  { %1933 = vmatpush3.bf16.msra.mxu1 %v2034_v30 }
 0x7c3   :  { %1938 = vmatprep.subr.bf16.mxu1 %v2335_v15 }
 0x87d   :  { %v760_v46 = vpop.f32.mrf.mxu1 }
 0x87e   :  { %v761_v47 = vadd.f32 %v1750_v45, %v760_v46 }
 0x87f   :  { %v1916_v49 = vpop.f32.mrf.mxu1 }
 0x880   :  { %v769_v50 = vmul.f32 0.044715, %v761_v47  ;;  %v767_v3 = vmul.f32 0.5, %v761_v47 }
 0x881   :  { %v763_v51 = vpop.f32.mrf.mxu1 }
 0x882   :  { %v771_v52 = vmul.f32 %v769_v50, %v761_v47  ;;  %v764_v54 = vadd.f32 %v1750_v45, %v763_v51  ;;  %v1761_v45 = vld [vmem:[%s2786_s15] ss:$0 sm:$0xff] }
 0x883   :  { %v1917_v55 = vpop.f32.mrf.mxu1 }
 0x884   :  { %v773_v56 = vmul.f32 %v771_v52, %v761_v47  ;;  %v770_v57 = vmul.f32 0.044715, %v764_v54  ;;  %v768_v4 = vmul.f32 0.5, %v764_v54  ;;  %v1770_v52 = vld [vmem:[#allocation10 + $0x1] ss:$0 sm:$0xff] }
 0x886   :  { %v775_v58 = vadd.f32 %v773_v56, %v761_v47  ;;  %v772_v59 = vmul.f32 %v770_v57, %v764_v54 }
 0x888   :  { %v777_v60 = vmul.f32 0.7978846, %v775_v58  ;;  %v774_v61 = vmul.f32 %v772_v59, %v764_v54 }
 0x88a   :  { %2069 = vtanh.f32 %v777_v60  ;;  %v776_v62 = vadd.f32 %v774_v61, %v764_v54 }
 0x88c   :  { %v778_v63 = vmul.f32 0.7978846, %v776_v62 }
 0x88e   :  { %2071 = vtanh.f32 %v778_v63 }
 0x897   :  { %v2070_v0 = vpop.eup %2069 }
 0x898   :  { %v781_v1 = vadd.f32 1.0, %v2070_v0 }
 0x89a   :  { %v783_v6 = vmul.f32 %v781_v1, %v767_v3 }
 0x89b   :  { %v2072_v2 = vpop.eup %2071 }
 0x89c   :  { %v782_v5 = vadd.f32 1.0, %v2072_v2 }
 0x89e   :  { %v784_v7 = vmul.f32 %v782_v5, %v768_v4 }
 0x8a0   :  { %v785_v8 = vpack.c.bf16 %v784_v7, %v783_v6 }
 0x8a2   :  { %1927 = vmatmul.mubr.msk.bf16.vlgmr.msra.gmra.mxu0 %vm825_vm3, %v785_v8 }
 0x8a3   :  { %1946 = vmatprep.mubr.msk.bf16.mxu0 %vm2336_vm1, %v2335_v15 }
 0x962   :  { %v863_v10 = vpop.f32.mrf.mxu0 }
 0x963   :  { %v864_v11 = vadd.f32 %v1754_v9, %v863_v10 }
 0x964   :  { %v1928_v12 = vpop.f32.mrf.mxu0 }
 0x965   :  { %v870_v13 = vadd.f32 %v864_v11, %v697_v38 }
 0x966   :  { %v866_v14 = vpop.f32.mrf.mxu0 }
 0x967   :  { %v867_v16 = vadd.f32 %v1754_v9, %v866_v14  ;;  %v874_v17 = vsel %vm173_vm0, %v870_v13, 0.0 }
 0x968   :  { %875 = vadd.xlane.f32.xlu1 %v874_v17  ;;  %v1929_v31 = vpop.f32.mrf.mxu0 }
 0x969   :  { %v871_v18 = vadd.f32 %v867_v16, %v698_v39 }
 0x96b   :  { %v877_v19 = vsel %vm173_vm0, %v871_v18, 0.0 }
 0x96c   :  { %878 = vadd.xlane.f32.xlu0 %v877_v19 }
 0x9f1   :  { %v876_v32 = vpop.xlane.xlu1 %875 }
 0x9f2   :  { %v880_v20 = vmul.f32 0.03125, %v876_v32 }
 0x9f4   :  { %v882_v21 = vsub.f32 %v870_v13, %v880_v20 }
 0x9f5   :  { %v879_v22 = vpop.xlane.xlu0 %878 }
 0x9f6   :  { %v881_v23 = vmul.f32 0.03125, %v879_v22  ;;  %v884_v24 = vmul.f32 %v882_v21, %v882_v21 }
 0x9f8   :  { %v883_v25 = vsub.f32 %v871_v18, %v881_v23  ;;  %v886_v26 = vsel %vm173_vm0, %v884_v24, 0.0 }
 0x9f9   :  { %887 = vadd.xlane.f32.xlu1 %v886_v26 }
 0x9fa   :  { %v885_v27 = vmul.f32 %v883_v25, %v883_v25 }
 0x9fc   :  { %v889_v28 = vsel %vm173_vm0, %v885_v27, 0.0 }
 0x9fd   :  { %890 = vadd.xlane.f32.xlu0 %v889_v28 }
 0xa82   :  { %v888_v33 = vpop.xlane.xlu1 %887 }
 0xa83   :  { %v892_v34 = vmul.f32 0.03125, %v888_v33 }
 0xa85   :  { %v894_v35 = vadd.f32 1e-12, %v892_v34 }
 0xa86   :  { %v891_v36 = vpop.xlane.xlu0 %890 }
 0xa87   :  { %2073 = vrsqrt.f32 %v894_v35  ;;  %v893_v37 = vmul.f32 0.03125, %v891_v36 }
 0xa89   :  { %v895_v38 = vadd.f32 1e-12, %v893_v37 }
 0xa8b   :  { %2075 = vrsqrt.f32 %v895_v38 }
 0xa94   :  { %v2074_v39 = vpop.eup %2073 }
 0xa95   :  { %v898_v40 = vmul.f32 %v2074_v39, %v882_v21 }
 0xa97   :  { %v906_v44 = vmul.f32 %v1760_v41, %v898_v40 }
 0xa98   :  { %v2076_v42 = vpop.eup %2075 }
 0xa99   :  { %v899_v43 = vmul.f32 %v2076_v42, %v883_v25  ;;  %v2634_v47 = vadd.f32 %v1761_v45, %v906_v44 }
 0xa9b   :  { %v907_v46 = vmul.f32 %v1760_v41, %v899_v43 }
 0xa9d   :  { %v2636_v49 = vadd.f32 %v1761_v45, %v907_v46 }
 0xa9f   :  { %v926_v50 = vpack.c.bf16 %v2636_v49, %v2634_v47 }
 0xaa1   :  { %1935 = vmatmul.mubr.msk.bf16.vlgmr.msra.gmra.mxu1 %vm173_vm0, %v926_v50 }
 0xaa2   :  { %1940 = vmatprep.mubr.msk.bf16.mxu1 %vm2336_vm1, %v2335_v15 }
 0xb61   :  { %v984_v51 = vpop.f32.mrf.mxu1 }
 0xb62   :  { %v985_v56 = vadd.f32 %v1770_v52, %v984_v51 }
 0xb63   :  { %v1936_v54 = vpop.f32.mrf.mxu1 }
 0xb65   :  { %v987_v55 = vpop.f32.mrf.mxu1 }
 0xb66   :  { %v988_v57 = vadd.f32 %v1770_v52, %v987_v55 }
 0xb67   :  { %v1937_v58 = vpop.f32.mrf.mxu1 }
 0xb68   :  { %v2643_v59 = vpack.c.bf16 %v988_v57, %v985_v56 }
 0xb6a   :  { %1119 = vrot.lane.b32.xlu0 %v2643_v59, %s2337_s3  ;;  %993 = vrot.lane.b32.xlu1 %v2643_v59, %s2338_s26 }
 0xb6e   :  { %1117 = vrot.lane.b32.xlu1 %v2643_v59, %s2339_s19 }
 0xbdc   :  { %v994_v60 = vpop.permute.xlu1 %993  ;;  %v1120_v62 = vpop.permute.xlu0 %1119 }
 0xbdd   :  { %v999_v61 = vsel %vm295_vm2, %v994_v60, 0  ;;  %v1125_v63 = vsel %vm295_vm2, %v1120_v62, 0  ;;  %v2035_v60 = vld [vmem:[%s2777_s6 + $0x10] sm:$0xff]  }
 0xbde   :  { %1939 = vmatpush3.bf16.xpose.msra.mxu1 %v999_v61  ;;  %v2036_v61 = vld [vmem:[%s2777_s6 + $0x18] sm:$0xff]  }
 0xbdf   :  { %1950 = vmatprep.subr.bf16.mxu1 %v2335_v15 }
 0xbe0   :  { %v1118_v0 = vpop.permute.xlu1 %1117 }
 0xbe5   :  { %1941 = vmatmul.mubr.msk.bf16.vlgmr.msra.gmra.mxu1 %vm295_vm2, %v2643_v59 }
 0xbe6   :  { %1951 = vmatpush3.bf16.xpose.msra.mxu1 %v1125_v63  ;;  %1952 = vmatprep.mubr.msk.bf16.mxu1 %vm2336_vm1, %v2335_v15 }
 0xbe7   :  { %1962 = vmatprep.subr.bf16.mxu1 %v2335_v15 }
 0xbed   :  { %1953 = vmatmul.mubr.msk.bf16.vlgmr.msra.gmra.mxu1 %vm295_vm2, %v1118_v0 }
 0xbee   :  { %1964 = vmatprep.mubr.msk.bf16.mxu1 %vm2336_vm1, %v2335_v15  ;;  %1963 = vmatpush3.bf16.msra.mxu1 %v2036_v61 }
 0xbef   :  { %1974 = vmatprep.subr.bf16.mxu1 %v2335_v15 }
 0xca5   :  { %v1035_v1 = vpop.f32.mrf.mxu1 }
 0xca6   :  { %v1042_v2 = vmul.f32 0.25, %v1035_v1 }
 0xca7   :  { %v1942_v3 = vpop.f32.mrf.mxu1 }
 0xca8   :  { %v1044_v4 = vadd.f32 %v1042_v2, %v2532_v48 }
 0xca9   :  { %v1038_v5 = vpop.f32.mrf.mxu1 }
 0xcaa   :  { %v1043_v6 = vmul.f32 0.25, %v1038_v5  ;;  %v1046_v7 = vsel %vm295_vm2, %v1044_v4, -inf }
 0xcab   :  { %1047 = vmax.xlane.f32.xlu1 %v1046_v7  ;;  %v1943_v8 = vpop.f32.mrf.mxu1 }
 0xcac   :  { %v1045_v9 = vadd.f32 %v1043_v6, %v2535_v53 }
 0xcad   :  { %v1161_v10 = vpop.f32.mrf.mxu1 }
 0xcae   :  { %v1168_v11 = vmul.f32 0.25, %v1161_v10  ;;  %v1049_v12 = vsel %vm295_vm2, %v1045_v9, -inf }
 0xcaf   :  { %1050 = vmax.xlane.f32.xlu0 %v1049_v12  ;;  %v1954_v13 = vpop.f32.mrf.mxu1 }
 0xcb0   :  { %v1170_v14 = vadd.f32 %v1168_v11, %v2532_v48 }
 0xcb1   :  { %v1164_v16 = vpop.f32.mrf.mxu1 }
 0xcb2   :  { %v1169_v17 = vmul.f32 0.25, %v1164_v16  ;;  %v1172_v31 = vsel %vm295_vm2, %v1170_v14, -inf  ;;  %v1782_v16 = vld [vmem:[#allocation11 + $0x1] ss:$0 sm:$0xff] }
 0xcb3   :  { %1173 = vmax.xlane.f32.xlu0 %v1172_v31  ;;  %v1955_v18 = vpop.f32.mrf.mxu1 }
 0xcb4   :  { %v1171_v19 = vadd.f32 %v1169_v17, %v2535_v53 }
 0xcb6   :  { %v1175_v32 = vsel %vm295_vm2, %v1171_v19, -inf }
 0xcb7   :  { %1176 = vmax.xlane.f32.xlu1 %v1175_v32 }
 0xd34   :  { %v1048_v20 = vpop.xlane.xlu1 %1047 }
 0xd35   :  { %v1052_v21 = vsub.f32 %v1044_v4, %v1048_v20 }
 0xd37   :  { %v1054_v22 = vmul.f32 1.442695, %v1052_v21 }
 0xd38   :  { %v1051_v23 = vpop.xlane.xlu0 %1050 }
 0xd39   :  { %2077 = vpow2.f32 %v1054_v22  ;;  %v1053_v24 = vsub.f32 %v1045_v9, %v1051_v23 }
 0xd3b   :  { %v1056_v25 = vmul.f32 1.442695, %v1053_v24 }
 0xd3c   :  { %v1174_v26 = vpop.xlane.xlu0 %1173 }
 0xd3d   :  { %2079 = vpow2.f32 %v1056_v25  ;;  %v1178_v48 = vsub.f32 %v1170_v14, %v1174_v26 }
 0xd3f   :  { %v1180_v27 = vmul.f32 1.442695, %v1178_v48 }
 0xd40   :  { %v1177_v28 = vpop.xlane.xlu1 %1176 }
 0xd41   :  { %2081 = vpow2.f32 %v1180_v27  ;;  %v1179_v29 = vsub.f32 %v1171_v19, %v1177_v28 }
 0xd43   :  { %v1182_v30 = vmul.f32 1.442695, %v1179_v29 }
 0xd45   :  { %2083 = vpow2.f32 %v1182_v30 }
 0xd46   :  { %v2078_v53 = vpop.eup %2077 }
 0xd47   :  { %v1058_v33 = vsel %vm295_vm2, %v2078_v53, 0.0 }
 0xd48   :  { %1059 = vadd.xlane.f32.xlu0 %v1058_v33  ;;  %v2038_v33 = vld [vmem:[%s2781_s10 + $0x10] sm:$0xff]  }
 0xd4a   :  { %v2080_v34 = vpop.eup %2079 }
 0xd4b   :  { %v1061_v35 = vsel %vm295_vm2, %v2080_v34, 0.0 }
 0xd4c   :  { %1062 = vadd.xlane.f32.xlu1 %v1061_v35 }
 0xd4e   :  { %v2082_v36 = vpop.eup %2081 }
 0xd4f   :  { %v1184_v37 = vsel %vm295_vm2, %v2082_v36, 0.0 }
 0xd50   :  { %1185 = vadd.xlane.f32.xlu0 %v1184_v37 }
 0xd52   :  { %v2084_v38 = vpop.eup %2083 }
 0xd53   :  { %v1187_v39 = vsel %vm295_vm2, %v2084_v38, 0.0 }
 0xd54   :  { %1188 = vadd.xlane.f32.xlu1 %v1187_v39 }
 0xd65   :  { %1195 = vrot.lane.b32.xlu1 %v2643_v59, %s2341_s28 }
 0xd66   :  { %1069 = vrot.lane.b32.xlu0 %v2643_v59, %s2340_s27 }
 0xdd1   :  { %v1060_v40 = vpop.xlane.xlu0 %1059 }
 0xdd2   :  { %2085 = vrcp.f32 %v1060_v40 }
 0xdd5   :  { %v1063_v41 = vpop.xlane.xlu1 %1062 }
 0xdd6   :  { %2087 = vrcp.f32 %v1063_v41 }
 0xdd9   :  { %v1186_v42 = vpop.xlane.xlu0 %1185 }
 0xdda   :  { %2089 = vrcp.f32 %v1186_v42  ;;  %v1783_v42 = vld [vmem:[#allocation13 + $0x1] ss:$0 sm:$0xff] }
 0xddd   :  { %v1070_v43 = vpop.permute.xlu0 %1069  ;;  %v1189_v44 = vpop.xlane.xlu1 %1188 }
 0xdde   :  { %2091 = vrcp.f32 %v1189_v44  ;;  %1945 = vmatpush3.bf16.msra.mxu0 %v1070_v43 }
 0xddf   :  { %1956 = vmatprep.subr.bf16.mxu0 %v2335_v15  ;;  %v2086_v45 = vpop.eup %2085 }
 0xde0   :  { %v1066_v50 = vmul.f32 %v2086_v45, %v2078_v53  ;;  %v2037_v53 = vld [vmem:[%s2781_s10 + $0x18] sm:$0xff]  }
 0xde1   :  { %v1196_v54 = vpop.permute.xlu1 %1195 }
 0xde3   :  { %v2088_v46 = vpop.eup %2087 }
 0xde4   :  { %v1067_v51 = vmul.f32 %v2088_v46, %v2080_v34  ;;  %v1784_v46 = vld [vmem:[#allocation14 + $0x1] ss:$0 sm:$0xff] }
 0xde6   :  { %v1068_v52 = vpack.c.bf16 %v1067_v51, %v1066_v50 }
 0xde7   :  { %v2090_v55 = vpop.eup %2089 }
 0xde8   :  { %1947 = vmatmul.mubr.msk.bf16.vlgmr.msra.gmra.mxu0 %vm295_vm2, %v1068_v52  ;;  %v1192_v57 = vmul.f32 %v2090_v55, %v2082_v36  ;;  %v2039_v55 = vld [vmem:[%s2783_s12 + $0x38] sm:$0xff]  }
 0xde9   :  { %1957 = vmatpush3.bf16.msra.mxu0 %v1196_v54  ;;  %1958 = vmatprep.mubr.msk.bf16.mxu0 %vm2336_vm1, %v2335_v15 }
 0xdea   :  { %1968 = vmatprep.subr.bf16.mxu0 %v2335_v15 }
 0xdeb   :  { %v2092_v56 = vpop.eup %2091 }
 0xdec   :  { %v1193_v58 = vmul.f32 %v2092_v56, %v2084_v38  ;;  %v2040_v56 = vld [vmem:[%s2783_s12 + $0x30] sm:$0xff]  }
 0xdee   :  { %v1194_v59 = vpack.c.bf16 %v1193_v58, %v1192_v57  ;;  %v2041_v57 = vld [vmem:[%s2783_s12 + $0x28] sm:$0xff]   ;;  %v2042_v58 = vld [vmem:[%s2783_s12 + $0x20] sm:$0xff]  }
 0xdf0   :  { %1959 = vmatmul.mubr.msk.bf16.vlgmr.msra.gmra.mxu0 %vm295_vm2, %v1194_v59  ;;  %v1790_v59 = vld [vmem:[%s2782_s11 + $0x1] ss:$0 sm:$0xff] }
 0xdf1   :  { %1970 = vmatprep.mubr.msk.bf16.mxu0 %vm2336_vm1, %v2335_v15  ;;  %1969 = vmatpush3.bf16.msra.mxu0 %v2035_v60 }
 0xdf2   :  { %1982 = vmatprep.subr.bf16.mxu0 %v2335_v15 }
 0xea8   :  { %v1109_v62 = vpop.f32.mrf.mxu0 }
 0xeaa   :  { %v1948_v63 = vpop.f32.mrf.mxu0 }
 0xeac   :  { %v1112_v0 = vpop.f32.mrf.mxu0 }
 0xead   :  { %v1116_v1 = vpack.c.bf16 %v1112_v0, %v1109_v62 }
 0xeae   :  { %v1949_v2 = vpop.f32.mrf.mxu0 }
 0xeaf   :  { %1971 = vmatmul.mubr.msk.bf16.vlgmr.msra.gmra.mxu0 %vm295_vm2, %v1116_v1 }
 0xeb0   :  { %v1235_v3 = vpop.f32.mrf.mxu0  ;;  %1990 = vmatprep.mubr.msk.bf16.mxu0 %vm2336_vm1, %v2335_v15  ;;  %1983 = vmatpush3.bf16.msra.mxu0 %v2039_v55 }
 0xeb1   :  { %1984 = vmatprep.subr.bf16.mxu0 %v2335_v15 }
 0xeb2   :  { %v1960_v4 = vpop.f32.mrf.mxu0 }
 0xeb4   :  { %v1238_v5 = vpop.f32.mrf.mxu0  ;;  %1985 = vmatpush3.bf16.msra.mxu0 %v2040_v56 }
 0xeb5   :  { %v1242_v6 = vpack.c.bf16 %v1238_v5, %v1235_v3  ;;  %1986 = vmatprep.subr.bf16.mxu0 %v2335_v15 }
 0xeb6   :  { %v1961_v7 = vpop.f32.mrf.mxu0 }
 0xeb7   :  { %1965 = vmatmul.mubr.msk.bf16.vlgmr.msra.gmra.mxu1 %vm295_vm2, %v1242_v6 }
 0xeb8   :  { %1978 = vmatprep.mubr.msk.bf16.mxu1 %vm2336_vm1, %v2335_v15  ;;  %1975 = vmatpush3.bf16.msra.mxu1 %v2037_v53 }
 0xeb9   :  { %1976 = vmatprep.subr.bf16.mxu1 %v2335_v15  ;;  %1987 = vmatpush3.bf16.msra.mxu0 %v2041_v57 }
 0xeba   :  { %1988 = vmatprep.subr.bf16.mxu0 %v2335_v15 }
 0xebc   :  { %1977 = vmatpush3.bf16.msra.mxu1 %v2038_v33 }
 0xebd   :  { %1994 = vmatprep.subr.bf16.mxu1 %v2335_v15  ;;  %1989 = vmatpush3.bf16.msra.mxu0 %v2042_v58 }
 0xf6f   :  { %v1336_v8 = vpop.f32.mrf.mxu0 }
 0xf71   :  { %v1972_v9 = vpop.f32.mrf.mxu0 }
 0xf73   :  { %v1339_v10 = vpop.f32.mrf.mxu0 }
 0xf75   :  { %v1973_v11 = vpop.f32.mrf.mxu0 }
 0xf77   :  { %v1286_v12 = vpop.f32.mrf.mxu1 }
 0xf78   :  { %v1337_v13 = vadd.f32 %v1336_v8, %v1286_v12 }
 0xf79   :  { %v1966_v14 = vpop.f32.mrf.mxu1 }
 0xf7a   :  { %v1343_v17 = vadd.f32 %v1337_v13, %v2634_v47 }
 0xf7b   :  { %v1289_v31 = vpop.f32.mrf.mxu1 }
 0xf7c   :  { %v1340_v18 = vadd.f32 %v1339_v10, %v1289_v31  ;;  %v1353_v19 = vadd.f32 %v1782_v16, %v1343_v17 }
 0xf7d   :  { %v1967_v32 = vpop.f32.mrf.mxu1 }
 0xf7e   :  { %v1344_v20 = vadd.f32 %v1340_v18, %v2636_v49  ;;  %v1359_v21 = vsel %vm173_vm0, %v1353_v19, 0.0 }
 0xf7f   :  { %1360 = vadd.xlane.f32.xlu1 %v1359_v21 }
 0xf80   :  { %v1354_v22 = vadd.f32 %v1782_v16, %v1344_v20  ;;  %v1803_v20 = vld [vmem:[%s2784_s13 + $0x1] ss:$0 sm:$0xff] }
 0xf82   :  { %v1362_v23 = vsel %vm173_vm0, %v1354_v22, 0.0 }
 0xf83   :  { %1363 = vadd.xlane.f32.xlu0 %v1362_v23 }
0x1008   :  { %v1361_v24 = vpop.xlane.xlu1 %1360 }
0x1009   :  { %v1365_v25 = vmul.f32 0.03125, %v1361_v24 }
0x100b   :  { %v1367_v26 = vsub.f32 %v1353_v19, %v1365_v25 }
0x100c   :  { %v1364_v48 = vpop.xlane.xlu0 %1363 }
0x100d   :  { %v1366_v27 = vmul.f32 0.03125, %v1364_v48  ;;  %v1369_v28 = vmul.f32 %v1367_v26, %v1367_v26 }
0x100f   :  { %v1368_v47 = vsub.f32 %v1354_v22, %v1366_v27  ;;  %v1371_v29 = vsel %vm173_vm0, %v1369_v28, 0.0 }
0x1010   :  { %1372 = vadd.xlane.f32.xlu0 %v1371_v29 }
0x1011   :  { %v1370_v30 = vmul.f32 %v1368_v47, %v1368_v47 }
0x1013   :  { %v1374_v49 = vsel %vm173_vm0, %v1370_v30, 0.0 }
0x1014   :  { %1375 = vadd.xlane.f32.xlu1 %v1374_v49 }
0x1099   :  { %v1373_v34 = vpop.xlane.xlu0 %1372 }
0x109a   :  { %v1377_v35 = vmul.f32 0.03125, %v1373_v34 }
0x109c   :  { %v1379_v36 = vadd.f32 1e-12, %v1377_v35 }
0x109d   :  { %v1376_v37 = vpop.xlane.xlu1 %1375 }
0x109e   :  { %2093 = vrsqrt.f32 %v1379_v36  ;;  %v1378_v38 = vmul.f32 0.03125, %v1376_v37 }
0x10a0   :  { %v1380_v39 = vadd.f32 1e-12, %v1378_v38 }
0x10a2   :  { %2095 = vrsqrt.f32 %v1380_v39  ;;  %v2043_v39 = vld [vmem:[%s2787_s16 + $0x8] sm:$0xff]  }
0x10ab   :  { %v2094_v40 = vpop.eup %2093 }
0x10ac   :  { %v1383_v41 = vmul.f32 %v2094_v40, %v1367_v26  ;;  %v2044_v40 = vld [vmem:[%s2787_s16] sm:$0xff]   ;;  %s2342_s16 = smov [#allocation16]  }
0x10ae   :  { %v1391_v45 = vmul.f32 %v1783_v42, %v1383_v41 }
0x10af   :  { %v2096_v43 = vpop.eup %2095 }
0x10b0   :  { %v1384_v44 = vmul.f32 %v2096_v43, %v1368_v47  ;;  %v1399_v51 = vadd.f32 %v1784_v46, %v1391_v45 }
0x10b2   :  { %v1392_v50 = vmul.f32 %v1783_v42, %v1384_v44 }
0x10b4   :  { %v1400_v52 = vadd.f32 %v1784_v46, %v1392_v50 }
0x10b6   :  { %v1401_v54 = vpack.c.bf16 %v1400_v52, %v1399_v51 }
0x10b8   :  { %1979 = vmatmul.mubr.msk.bf16.vlgmr.msra.gmra.mxu1 %vm173_vm0, %v1401_v54  ;;  %v1812_v54 = vld [vmem:[%s2786_s15 + $0x1] ss:$0 sm:$0xff] }
0x10b9   :  { %1998 = vmatprep.mubr.msk.bf16.mxu1 %vm2336_vm1, %v2335_v15  ;;  %1995 = vmatpush3.bf16.msra.mxu1 %v2043_v39 }
0x10ba   :  { %1996 = vmatprep.subr.bf16.mxu1 %v2335_v15 }
0x10bd   :  { %1997 = vmatpush3.bf16.msra.mxu1 %v2044_v40 }
0x1178   :  { %v1464_v60 = vpop.f32.mrf.mxu1 }
0x1179   :  { %v1465_v61 = vadd.f32 %v1790_v59, %v1464_v60 }
0x117a   :  { %v1980_v62 = vpop.f32.mrf.mxu1 }
0x117b   :  { %v1473_v63 = vmul.f32 0.044715, %v1465_v61  ;;  %v1471_v16 = vmul.f32 0.5, %v1465_v61 }
0x117c   :  { %v1467_v0 = vpop.f32.mrf.mxu1 }
0x117d   :  { %v1475_v1 = vmul.f32 %v1473_v63, %v1465_v61  ;;  %v1468_v2 = vadd.f32 %v1790_v59, %v1467_v0 }
0x117e   :  { %v1981_v3 = vpop.f32.mrf.mxu1 }
0x117f   :  { %v1477_v4 = vmul.f32 %v1475_v1, %v1465_v61  ;;  %v1474_v5 = vmul.f32 0.044715, %v1468_v2  ;;  %v1472_v17 = vmul.f32 0.5, %v1468_v2 }
0x1181   :  { %v1479_v6 = vadd.f32 %v1477_v4, %v1465_v61  ;;  %v1476_v7 = vmul.f32 %v1474_v5, %v1468_v2 }
0x1183   :  { %v1481_v8 = vmul.f32 0.7978846, %v1479_v6  ;;  %v1478_v9 = vmul.f32 %v1476_v7, %v1468_v2 }
0x1185   :  { %2097 = vtanh.f32 %v1481_v8  ;;  %v1480_v10 = vadd.f32 %v1478_v9, %v1468_v2 }
0x1187   :  { %v1482_v11 = vmul.f32 0.7978846, %v1480_v10 }
0x1189   :  { %2099 = vtanh.f32 %v1482_v11 }
0x1192   :  { %v2098_v12 = vpop.eup %2097 }
0x1193   :  { %v1485_v13 = vadd.f32 1.0, %v2098_v12 }
0x1195   :  { %v1487_v18 = vmul.f32 %v1485_v13, %v1471_v16 }
0x1196   :  { %v2100_v14 = vpop.eup %2099 }
0x1197   :  { %v1486_v31 = vadd.f32 1.0, %v2100_v14 }
0x1199   :  { %v1488_v19 = vmul.f32 %v1486_v31, %v1472_v17 }
0x119b   :  { %v1489_v32 = vpack.c.bf16 %v1488_v19, %v1487_v18 }
0x119d   :  { %1991 = vmatmul.mubr.msk.bf16.vlgmr.msra.gmra.mxu0 %vm825_vm3, %v1489_v32 }
0x125d   :  { %v1568_v21 = vpop.f32.mrf.mxu0 }
0x125e   :  { %v1569_v22 = vadd.f32 %v1803_v20, %v1568_v21 }
0x125f   :  { %v1992_v23 = vpop.f32.mrf.mxu0 }
0x1260   :  { %v1575_v24 = vadd.f32 %v1569_v22, %v1399_v51  ;;  %v1811_v51 = vld [vmem:[%s2785_s14 + $0x1] ss:$0 sm:$0xff]  ;;  %s1703_s14 = sshll.u32 %s2342_s16, 4  ;;  %s1704_s14 = int_to_ptr.vmem [resolvable:$true] %s1703_s14 }
0x1261   :  { %v1571_v25 = vpop.f32.mrf.mxu0  ;;  %s2269_s6 = scalar_lea.vmem %s1704_s14, 256  ;;  %p2274_p13 = scmp.lt.s32.totalorder %s1704_s14, %s1704_s14 }
0x1262   :  { %v1572_v26 = vadd.f32 %v1803_v20, %v1571_v25  ;;  %v1581_v48 = vsel %vm173_vm0, %v1575_v24, 0.0  ;;  %p2270_p12 = scmp.ne.s32.totalorder %s1704_s14, %s2269_s6  ;;  %p2275_p0 = scmp.lt.s32.totalorder %s2269_s6, %s2269_s6 }
0x1263   :  { %1582 = vadd.xlane.f32.xlu0 %v1581_v48  ;;  %v1993_v27 = vpop.f32.mrf.mxu0 }
0x1264   :  { %v1576_v28 = vadd.f32 %v1572_v26, %v1400_v52  ;;  %p2276_p1 = por %p2275_p0, %p2274_p13 }
0x1266   :  { %v1584_v47 = vsel %vm173_vm0, %v1576_v28, 0.0  ;;  %p2277_p2 = pnand %p2276_p1, %p2270_p12 }
0x1267   :  { %1585 = vadd.xlane.f32.xlu1 %v1584_v47 }
0x12ec   :  { %v1583_v29 = vpop.xlane.xlu0 %1582 }
0x12ed   :  { %v1587_v30 = vmul.f32 0.03125, %v1583_v29 }
0x12ef   :  { %v1589_v49 = vsub.f32 %v1575_v24, %v1587_v30 }
0x12f0   :  { %v1586_v53 = vpop.xlane.xlu1 %1585 }
0x12f1   :  { %v1588_v33 = vmul.f32 0.03125, %v1586_v53  ;;  %v1591_v34 = vmul.f32 %v1589_v49, %v1589_v49 }
0x12f3   :  { %v1590_v35 = vsub.f32 %v1576_v28, %v1588_v33  ;;  %v1593_v36 = vsel %vm173_vm0, %v1591_v34, 0.0 }
0x12f4   :  { %1594 = vadd.xlane.f32.xlu0 %v1593_v36 }
0x12f5   :  { %v1592_v37 = vmul.f32 %v1590_v35, %v1590_v35 }
0x12f7   :  { %v1596_v38 = vsel %vm173_vm0, %v1592_v37, 0.0 }
0x12f8   :  { %1597 = vadd.xlane.f32.xlu1 %v1596_v38 }
0x137d   :  { %v1595_v41 = vpop.xlane.xlu0 %1594 }
0x137e   :  { %v1599_v42 = vmul.f32 0.03125, %v1595_v41 }
0x1380   :  { %v1601_v43 = vadd.f32 1e-12, %v1599_v42 }
0x1381   :  { %v1598_v44 = vpop.xlane.xlu1 %1597 }
0x1382   :  { %2101 = vrsqrt.f32 %v1601_v43  ;;  %v1600_v45 = vmul.f32 0.03125, %v1598_v44 }
0x1384   :  { %v1602_v46 = vadd.f32 1e-12, %v1600_v45 }
0x1386   :  { %2103 = vrsqrt.f32 %v1602_v46 }
0x138f   :  { %v2102_v50 = vpop.eup %2101 }
0x1390   :  { %v1605_v52 = vmul.f32 %v2102_v50, %v1589_v49 }
0x1392   :  { %v1613_v15 = vmul.f32 %v1811_v51, %v1605_v52 }
0x1393   :  { %v2104_v55 = vpop.eup %2103 }
0x1394   :  { %v1606_v56 = vmul.f32 %v2104_v55, %v1590_v35  ;;  %v1621_v57 = vadd.f32 %v1812_v54, %v1613_v15 }
0x1396   :  { %v1614_v58 = vmul.f32 %v1811_v51, %v1606_v56  ;;  %1623 = vst.msk [vmem:[#allocation16] sm:$0xff] %vm173_vm0, %v1621_v57 }
0x1398   :  { %v1622_v59 = vadd.f32 %v1812_v54, %v1614_v58 }
0x139a   :  { %v1625_v60 = vpack.c.bf16 %v1622_v59, %v1621_v57  ;;  %1624 = vst.msk [vmem:[#allocation16 + $0x8] sm:$0xff] %vm173_vm0, %v1622_v59 }
0x139c   :  { %1999 = vmatmul.mubr.msk.bf16.vlgmr.msra.gmra.mxu1 %vm173_vm0, %v1625_v60 }
0x139d   :  { %2280 = shalt.err (!%p2277_p2)
}
0x139e   :  { %1709 = dma.vmem_to_hbm [thread:$0]  %s1704_s14, 256, %s2789_s18, [#allocation4], %s2325_s22, %s2325_s22, %s2326_s2   ;;  %vm1695_vm4 = vcmask 253952  }
0x139f   :  { %v1813_v61 = vld [vmem:[%s2788_s17] ss:$0 sm:$0xff]  ;;  %s2343_s10 = smov [#allocation17]  }
0x13a0   :  { %s1716_s0 = sshll.u32 %s2343_s10, 4  ;;  %s1717_s0 = int_to_ptr.vmem [resolvable:$true] %s1716_s0 }
0x13a1   :  { %s2289_s18 = scalar_lea.vmem %s1717_s0, 32  ;;  %p2294_p4 = scmp.lt.s32.totalorder %s1717_s0, %s1717_s0 }
0x13a2   :  { %p2290_p3 = scmp.ne.s32.totalorder %s1717_s0, %s2289_s18  ;;  %p2295_p5 = scmp.lt.s32.totalorder %s2289_s18, %s2289_s18 }
0x13a4   :  { %p2296_p6 = por %p2295_p5, %p2294_p4 }
0x13a6   :  { %p2297_p7 = pnand %p2296_p6, %p2290_p3 }
0x145c   :  { %v1686_v62 = vpop.f32.mrf.mxu1 }
0x145d   :  { %v1687_v63 = vadd.f32 %v1813_v61, %v1686_v62 }
0x145e   :  { %v2000_v0 = vpop.f32.mrf.mxu1 }
0x145f   :  { %2105 = vtanh.f32 %v1687_v63 }
0x1460   :  { %v1689_v1 = vpop.f32.mrf.mxu1 }
0x1461   :  { %v1690_v2 = vadd.f32 %v1813_v61, %v1689_v1 }
0x1462   :  { %v2001_v3 = vpop.f32.mrf.mxu1 }
0x1463   :  { %2107 = vtanh.f32 %v1690_v2 }
0x146c   :  { %v2106_v4 = vpop.eup %2105 }
0x146d   :  { %1696 = vst.msk [vmem:[#allocation17] sm:$0x1] %vm1695_vm4, %v2106_v4 }
0x1470   :  { %v2108_v5 = vpop.eup %2107 }
0x1471   :  { %1697 = vst.msk [vmem:[#allocation17 + $0x1] sm:$0x1] %vm1695_vm4, %v2108_v5 }
0x1472   :  { %2300 = shalt.err (!%p2297_p7)
}
0x1473   :  { %s2800_s2 = sld [smem:[#allocation30_spill]] }
0x1479   :  { %1719 = dma.vmem_to_hbm [thread:$0]  %s1717_s0, 32, %s2800_s2, [#allocation18]  }
0x147a   :  { %2319 = dma.done.wait [#allocation4], 256  }
0x147b   :  { %2320 = vsyncadd [#allocation4], 4294967040 }
0x147c   :  { %2321 = dma.done.wait [#allocation18], 32  }
0x147d   :  { %2322 = vsyncadd [#allocation18], 4294967264 }
0x147e   :  { %1726 = vsyncpa [#allocation3], 1 }
0x147f   :  { %1727 = vsyncpa [#allocation6], 1 }
0x1480   :  { %1728 = vsyncpa [#allocation9], 1 }
0x1481   :  { %1729 = vsyncpa [#allocation12], 1 }
0x1482   :  { %1730 = vsyncpa [#allocation15], 1 }
0x1483   :  { %1731 = vsyncpa [#allocation4], 1 }
0x1484   :  { %1732 = vsyncpa [#allocation18], 1 }

</bundles_post_ra>
